<compile_context>
chip_gen: v7x
topology: tpu7x:2x2x1
jax: 0.10.0
libtpu: 0.0.40
codegen_flags: <defaults>
</compile_context>

<pallas_src>
import jax
import jax.numpy as jnp
from jax.experimental import pallas as pl
from jax.experimental.pallas import tpu as pltpu

# ----------------------------- configuration -------------------------------
NUM_COLS = [0, 1, 2, 3]
CATEGORIES = [3, 5]
D_EMBEDDING = 8
D = 32
D_HIDDEN_FACTOR = 2.0
N_LAYERS = 2
D_OUT = 1
LN_EPS = 1e-5

D_NUMERICAL = len(NUM_COLS)
INPUT_DIM = D_NUMERICAL + len(CATEGORIES)
CAT_COLS = [i for i in range(INPUT_DIM) if i not in NUM_COLS]
D_HIDDEN = int(D * D_HIDDEN_FACTOR)                        # 64
D_IN = D_NUMERICAL + len(CATEGORIES) * D_EMBEDDING         # 4 + 2*8 = 20

SLAB_COLS = 128      # parameter slab lane width
TB_MAX = 2048        # max batch rows per grid step (lane axis)
BATCH = 256          # example batch (2 grid steps -> exercises tiling + megacore)


def _round_up(x, m):
    return ((x + m - 1) // m) * m


def _choose_tb(batch, tb_max=TB_MAX):
    """Biggest lane tile <= tb_max (multiple of 128), keeping >=2 grid steps
    when batch > 128 so v7x's two TensorCores both get work."""
    b128 = _round_up(batch, 128)
    tb = min(tb_max, b128)
    if b128 > 128 and b128 <= tb:          # would collapse to a single grid step
        tb = _round_up(b128 // 2, 128)
    return tb


# --------------------- parameter slab layout (static) ----------------------
def _build_layout():
    layout = {}
    off = 0

    def add(name, rows, cols):
        nonlocal off
        layout[name] = (off, rows, cols)
        off += ((rows + 7) // 8) * 8       # keep every param 8-sublane aligned

    add("fw", D, D_IN)                     # first_layer.weight  (out, in)
    add("fb", D, 1)                        # first_layer.bias    (column)
    for l in range(N_LAYERS):
        add(f"nw{l}", D, 1)                # norm.weight
        add(f"nb{l}", D, 1)                # norm.bias
        add(f"w0{l}", 2 * D_HIDDEN, D)     # linear0.weight stacked [a; gate]  (128, 32)
        add(f"b0{l}", 2 * D_HIDDEN, 1)     # linear0.bias
        add(f"w1{l}", D, D_HIDDEN)         # linear1.weight
        add(f"b1{l}", D, 1)                # linear1.bias
    add("lnw", D, 1)                       # last_normalization.weight
    add("lnb", D, 1)                       # last_normalization.bias
    add("hw", D, D_OUT)                    # head.weight stored as a column (D_OUT == 1)
    add("hb", 1, 1)                        # head.bias
    rows_total = ((off + 7) // 8) * 8
    return layout, rows_total


LAYOUT, SLAB_ROWS = _build_layout()


def pack_params(p):
    """Pack the logical parameter dict into one (SLAB_ROWS, 128) f32 slab."""
    slab = jnp.zeros((SLAB_ROWS, SLAB_COLS), jnp.float32)
    for name, (off, rows, cols) in LAYOUT.items():
        arr = jnp.asarray(p[name], jnp.float32).reshape(rows, cols)
        slab = slab.at[off:off + rows, :cols].set(arr)
    return slab


# ------------------------------ Pallas kernel ------------------------------
def _layernorm_t(x, w, b):
    # x: (D, TB), feature axis = sublanes -> cheap sublane reduce; rsqrt on the EUP.
    mean = jnp.mean(x, axis=0, keepdims=True)
    var = jnp.mean((x - mean) ** 2, axis=0, keepdims=True)
    return (x - mean) * jax.lax.rsqrt(var + LN_EPS) * w + b


def resnet_kernel(x_ref, slab_ref, out_ref):
    def p(name):
        off, rows, cols = LAYOUT[name]
        return slab_ref[off:off + rows, 0:cols]

    x = x_ref[...]                                                   # (D_IN, TB) f32

    # first_layer: W @ x + b  ->  (D, TB)
    h = jnp.dot(p("fw"), x, preferred_element_type=jnp.float32) + p("fb")

    # residual blocks (statically unrolled; N_LAYERS is tiny)
    for l in range(N_LAYERS):
        z = _layernorm_t(h, p(f"nw{l}"), p(f"nb{l}"))
        # One stacked dot for both ReGLU halves; split along sublanes at row 64 (free).
        r = jnp.dot(p(f"w0{l}"), z, preferred_element_type=jnp.float32) + p(f"b0{l}")
        a = r[:D_HIDDEN, :]                                          # (D_HIDDEN, TB)
        g = r[D_HIDDEN:, :]                                          # (D_HIDDEN, TB)
        z = a * jnp.maximum(g, 0.0)                                  # ReGLU
        # hidden_dropout = 0.0 -> identity
        z = jnp.dot(p(f"w1{l}"), z, preferred_element_type=jnp.float32) + p(f"b1{l}")
        # residual_dropout = 0.0 -> identity
        h = h + z

    # last_normalization -> relu -> head (D_OUT == 1: VPU mul + sublane reduce)
    h = _layernorm_t(h, p("lnw"), p("lnb"))
    h = jnp.maximum(h, 0.0)
    out = jnp.sum(p("hw") * h, axis=0, keepdims=True) + p("hb")      # (1, TB) lane-dense
    out_ref[...] = out.astype(out_ref.dtype)


def resnet_forward_pallas(x_t, slab, *, tb_max=TB_MAX):
    """x_t: (D_IN, B) float32, features-major (batch on the lane axis)."""
    d_in, batch = x_t.shape
    assert d_in == D_IN
    tb = _choose_tb(batch, tb_max)
    b_pad = _round_up(batch, tb)
    if b_pad != batch:
        x_t = jnp.pad(x_t, ((0, 0), (0, b_pad - batch)))

    flops = 2 * b_pad * (D_IN * D
                         + N_LAYERS * (D * 2 * D_HIDDEN + D_HIDDEN * D)
                         + D)
    cost = pl.CostEstimate(
        flops=flops,
        transcendentals=3 * b_pad,                                   # rsqrt per LN per column
        bytes_accessed=(D_IN * b_pad + b_pad + SLAB_ROWS * SLAB_COLS) * 4,
    )

    out = pl.pallas_call(
        resnet_kernel,
        out_shape=jax.ShapeDtypeStruct((1, b_pad), jnp.float32),
        grid=(b_pad // tb,),
        in_specs=[
            pl.BlockSpec((D_IN, tb), lambda i: (0, i)),              # activations, lane-dense
            pl.BlockSpec(memory_space=pltpu.MemorySpace.VMEM),       # whole param slab, single-buffered
        ],
        out_specs=pl.BlockSpec((1, tb), lambda i: (0, i)),           # lane-dense store
        compiler_params=pltpu.CompilerParams(
            dimension_semantics=("parallel",)),
        cost_estimate=cost,
    )(x_t, slab)
    return out[0, :batch]                                            # == x.squeeze(-1)


# ------------------------------ glue (plain JAX) ---------------------------
def embed_and_concat_t(x_all, emb_table, category_offsets):
    """Emit the features-major (D_IN, B) activation directly (no full-matrix
    transpose in the perf path): slice numericals, embedding-gather categoricals,
    transpose the small pieces, concat along axis 0."""
    x_num_t = jnp.transpose(x_all[:, jnp.array(NUM_COLS)])           # (4, B)
    x_cat = x_all[:, jnp.array(CAT_COLS)]
    idx = x_cat.astype(jnp.int32) + category_offsets[None, :]
    emb = emb_table[idx]                                             # (B, n_cat, d_emb) (gather stays in XLA)
    emb_t = jnp.transpose(emb.reshape(x_all.shape[0], -1))           # (16, B)
    return jnp.concatenate([x_num_t, emb_t], axis=0).astype(jnp.float32)  # (D_IN, B)


def init_params(key):
    ks = jax.random.split(key, 8 + N_LAYERS)
    s = 0.1
    emb_table = jax.random.normal(ks[0], (sum(CATEGORIES), D_EMBEDDING), jnp.float32) * s
    p = {
        "fw": jax.random.normal(ks[1], (D, D_IN), jnp.float32) * s,
        "fb": jax.random.normal(ks[2], (D,), jnp.float32) * s,
        "lnw": jnp.ones((D,), jnp.float32),
        "lnb": jnp.zeros((D,), jnp.float32),
        "hw": jax.random.normal(ks[3], (D_OUT, D), jnp.float32) * s,
        "hb": jax.random.normal(ks[4], (D_OUT,), jnp.float32) * s,
    }
    for l in range(N_LAYERS):
        kl = jax.random.split(ks[5 + l], 4)
        p[f"nw{l}"] = jnp.ones((D,), jnp.float32)
        p[f"nb{l}"] = jnp.zeros((D,), jnp.float32)
        p[f"w0{l}"] = jax.random.normal(kl[0], (2 * D_HIDDEN, D), jnp.float32) * s
        p[f"b0{l}"] = jax.random.normal(kl[1], (2 * D_HIDDEN,), jnp.float32) * s
        p[f"w1{l}"] = jax.random.normal(kl[2], (D, D_HIDDEN), jnp.float32) * s
        p[f"b1{l}"] = jax.random.normal(kl[3], (D,), jnp.float32) * s
    category_offsets = jnp.cumsum(jnp.array([0] + CATEGORIES[:-1], jnp.int32))
    return emb_table, category_offsets, p


def reference_forward(x_in, p):
    """Pure-JAX reference of the in-kernel MLP (row-major, PyTorch orientation)."""
    def ln(x, w, b):
        m = jnp.mean(x, -1, keepdims=True)
        v = jnp.mean((x - m) ** 2, -1, keepdims=True)
        return (x - m) / jnp.sqrt(v + LN_EPS) * w + b

    h = x_in @ p["fw"].T + p["fb"]
    for l in range(N_LAYERS):
        z = ln(h, p[f"nw{l}"], p[f"nb{l}"])
        zz = z @ p[f"w0{l}"].T + p[f"b0{l}"]
        a, g = zz[:, :D_HIDDEN], zz[:, D_HIDDEN:]                    # reglu chunk(2, dim=-1)
        z = a * jax.nn.relu(g)
        z = z @ p[f"w1{l}"].T + p[f"b1{l}"]
        h = h + z
    h = jax.nn.relu(ln(h, p["lnw"], p["lnb"]))
    return jnp.squeeze(h @ p["hw"].T + p["hb"], axis=-1)


# ---------------------------------- main ------------------------------------
if __name__ == "__main__":
    key = jax.random.PRNGKey(0)
    k_param, k_num, k_cat0, k_cat1 = jax.random.split(key, 4)

    emb_table, category_offsets, params = init_params(k_param)
    slab = pack_params(params)

    # Build x_all (B, 6): numerical columns 0..3, categorical columns 4,5
    x_num = jax.random.normal(k_num, (BATCH, D_NUMERICAL), jnp.float32)
    c0 = jax.random.randint(k_cat0, (BATCH, 1), 0, CATEGORIES[0]).astype(jnp.float32)
    c1 = jax.random.randint(k_cat1, (BATCH, 1), 0, CATEGORIES[1]).astype(jnp.float32)
    x_all = jnp.concatenate([x_num, c0, c1], axis=-1)                # (B, 6)

    # Pre-MLP glue (slice / embedding gather / concat -> features-major), then the kernel.
    x_t = embed_and_concat_t(x_all, emb_table, category_offsets)     # (D_IN, B)
    out = resnet_forward_pallas(x_t, slab)                           # (B,)
    out = jax.block_until_ready(out)

    ref = reference_forward(jnp.transpose(x_t), params)              # reference path only
    assert out.shape == (BATCH,)
    assert jnp.allclose(out, ref, atol=1e-3, rtol=1e-3), (out[:8], ref[:8])

    print("KERNEL_OK")
</pallas_src>

<mosaic_0001>
module attributes {stable_mosaic.version = 11 : i64} {
  func.func @resnet_kernel(%arg0: i32, %arg1: memref<20x128xf32, #tpu.memory_space<vmem>>, %arg2: memref<936x128xf32, #tpu.memory_space<vmem>>, %arg3: memref<1x128xf32, #tpu.memory_space<vmem>>) attributes {dimension_semantics = [#tpu.dimension_semantics<parallel>], iteration_bounds = array<i64: 2>, scalar_prefetch = 0 : i64, scratch_operands = 0 : i64, tpu.core_type = #tpu.core_type<tc>, window_params = [{transform_indices = @transform_0, window_bounds = array<i64: 20, 128>}, {pipeline_mode = #tpu.pipeline_mode<synchronous>, transform_indices = @transform_1, window_bounds = array<i64: 936, 128>}, {transform_indices = @transform_2, window_bounds = array<i64: 1, 128>}]} {
    %c0 = arith.constant 0 : index
    %c0_0 = arith.constant 0 : index
    %0 = vector.load %arg1[%c0, %c0_0] : memref<20x128xf32, #tpu.memory_space<vmem>>, vector<20x128xf32>
    %c0_1 = arith.constant 0 : index
    %c0_2 = arith.constant 0 : index
    %1 = vector.load %arg2[%c0_1, %c0_2] : memref<936x128xf32, #tpu.memory_space<vmem>>, vector<32x20xf32>
    %cst = arith.constant dense<0.000000e+00> : vector<32x128xf32>
    %2 = tpu.matmul %1, %0, %cst {dimension_numbers = #tpu.dot_dimension_numbers<[1], [0], [0], [1], [0, 0, 1, 1], [], []>} : vector<32x20xf32>, vector<20x128xf32>, vector<32x128xf32> -> vector<32x128xf32>
    %c32 = arith.constant 32 : index
    %c0_3 = arith.constant 0 : index
    %3 = vector.load %arg2[%c32, %c0_3] : memref<936x128xf32, #tpu.memory_space<vmem>>, vector<32x1xf32>
    %4 = vector.broadcast %3 : vector<32x1xf32> to vector<32x128xf32>
    %5 = arith.addf %2, %4 : vector<32x128xf32>
    %c64 = arith.constant 64 : index
    %c0_4 = arith.constant 0 : index
    %6 = vector.load %arg2[%c64, %c0_4] : memref<936x128xf32, #tpu.memory_space<vmem>>, vector<32x1xf32>
    %c96 = arith.constant 96 : index
    %c0_5 = arith.constant 0 : index
    %7 = vector.load %arg2[%c96, %c0_5] : memref<936x128xf32, #tpu.memory_space<vmem>>, vector<32x1xf32>
    %cst_6 = arith.constant dense<0.000000e+00> : vector<128xf32>
    %8 = vector.multi_reduction <add>, %5, %cst_6 [0] : vector<32x128xf32> to vector<128xf32>
    %9 = vector.shape_cast %8 : vector<128xf32> to vector<1x128xf32>
    %cst_7 = arith.constant 3.200000e+01 : f32
    %10 = vector.broadcast %cst_7 : f32 to vector<1x128xf32>
    %11 = arith.divf %9, %10 : vector<1x128xf32>
    %12 = vector.broadcast %11 : vector<1x128xf32> to vector<32x128xf32>
    %13 = arith.subf %5, %12 : vector<32x128xf32>
    %14 = arith.mulf %13, %13 : vector<32x128xf32>
    %cst_8 = arith.constant dense<0.000000e+00> : vector<128xf32>
    %15 = vector.multi_reduction <add>, %14, %cst_8 [0] : vector<32x128xf32> to vector<128xf32>
    %16 = vector.shape_cast %15 : vector<128xf32> to vector<1x128xf32>
    %cst_9 = arith.constant 3.200000e+01 : f32
    %17 = vector.broadcast %cst_9 : f32 to vector<1x128xf32>
    %18 = arith.divf %16, %17 : vector<1x128xf32>
    %19 = vector.broadcast %11 : vector<1x128xf32> to vector<32x128xf32>
    %20 = arith.subf %5, %19 : vector<32x128xf32>
    %cst_10 = arith.constant 9.99999974E-6 : f32
    %21 = vector.broadcast %cst_10 : f32 to vector<1x128xf32>
    %22 = arith.addf %18, %21 : vector<1x128xf32>
    %23 = math.rsqrt %22 : vector<1x128xf32>
    %24 = vector.broadcast %23 : vector<1x128xf32> to vector<32x128xf32>
    %25 = arith.mulf %20, %24 : vector<32x128xf32>
    %26 = vector.broadcast %6 : vector<32x1xf32> to vector<32x128xf32>
    %27 = arith.mulf %25, %26 : vector<32x128xf32>
    %28 = vector.broadcast %7 : vector<32x1xf32> to vector<32x128xf32>
    %29 = arith.addf %27, %28 : vector<32x128xf32>
    %c128 = arith.constant 128 : index
    %c0_11 = arith.constant 0 : index
    %30 = vector.load %arg2[%c128, %c0_11] : memref<936x128xf32, #tpu.memory_space<vmem>>, vector<128x32xf32>
    %cst_12 = arith.constant dense<0.000000e+00> : vector<128x128xf32>
    %31 = tpu.matmul %30, %29, %cst_12 {dimension_numbers = #tpu.dot_dimension_numbers<[1], [0], [0], [1], [0, 0, 1, 1], [], []>} : vector<128x32xf32>, vector<32x128xf32>, vector<128x128xf32> -> vector<128x128xf32>
    %c256 = arith.constant 256 : index
    %c0_13 = arith.constant 0 : index
    %32 = vector.load %arg2[%c256, %c0_13] : memref<936x128xf32, #tpu.memory_space<vmem>>, vector<128x1xf32>
    %33 = vector.broadcast %32 : vector<128x1xf32> to vector<128x128xf32>
    %34 = arith.addf %31, %33 : vector<128x128xf32>
    %35 = vector.extract_strided_slice %34 {offsets = [0, 0], sizes = [64, 128], strides = [1, 1]} : vector<128x128xf32> to vector<64x128xf32>
    %36 = vector.extract_strided_slice %34 {offsets = [64, 0], sizes = [64, 128], strides = [1, 1]} : vector<128x128xf32> to vector<64x128xf32>
    %cst_14 = arith.constant 0.000000e+00 : f32
    %37 = vector.broadcast %cst_14 : f32 to vector<64x128xf32>
    %38 = arith.maximumf %36, %37 : vector<64x128xf32>
    %39 = arith.mulf %35, %38 : vector<64x128xf32>
    %c384 = arith.constant 384 : index
    %c0_15 = arith.constant 0 : index
    %40 = vector.load %arg2[%c384, %c0_15] : memref<936x128xf32, #tpu.memory_space<vmem>>, vector<32x64xf32>
    %cst_16 = arith.constant dense<0.000000e+00> : vector<32x128xf32>
    %41 = tpu.matmul %40, %39, %cst_16 {dimension_numbers = #tpu.dot_dimension_numbers<[1], [0], [0], [1], [0, 0, 1, 1], [], []>} : vector<32x64xf32>, vector<64x128xf32>, vector<32x128xf32> -> vector<32x128xf32>
    %c416 = arith.constant 416 : index
    %c0_17 = arith.constant 0 : index
    %42 = vector.load %arg2[%c416, %c0_17] : memref<936x128xf32, #tpu.memory_space<vmem>>, vector<32x1xf32>
    %43 = vector.broadcast %42 : vector<32x1xf32> to vector<32x128xf32>
    %44 = arith.addf %41, %43 : vector<32x128xf32>
    %45 = arith.addf %5, %44 : vector<32x128xf32>
    %c448 = arith.constant 448 : index
    %c0_18 = arith.constant 0 : index
    %46 = vector.load %arg2[%c448, %c0_18] : memref<936x128xf32, #tpu.memory_space<vmem>>, vector<32x1xf32>
    %c480 = arith.constant 480 : index
    %c0_19 = arith.constant 0 : index
    %47 = vector.load %arg2[%c480, %c0_19] : memref<936x128xf32, #tpu.memory_space<vmem>>, vector<32x1xf32>
    %cst_20 = arith.constant dense<0.000000e+00> : vector<128xf32>
    %48 = vector.multi_reduction <add>, %45, %cst_20 [0] : vector<32x128xf32> to vector<128xf32>
    %49 = vector.shape_cast %48 : vector<128xf32> to vector<1x128xf32>
    %cst_21 = arith.constant 3.200000e+01 : f32
    %50 = vector.broadcast %cst_21 : f32 to vector<1x128xf32>
    %51 = arith.divf %49, %50 : vector<1x128xf32>
    %52 = vector.broadcast %51 : vector<1x128xf32> to vector<32x128xf32>
    %53 = arith.subf %45, %52 : vector<32x128xf32>
    %54 = arith.mulf %53, %53 : vector<32x128xf32>
    %cst_22 = arith.constant dense<0.000000e+00> : vector<128xf32>
    %55 = vector.multi_reduction <add>, %54, %cst_22 [0] : vector<32x128xf32> to vector<128xf32>
    %56 = vector.shape_cast %55 : vector<128xf32> to vector<1x128xf32>
    %cst_23 = arith.constant 3.200000e+01 : f32
    %57 = vector.broadcast %cst_23 : f32 to vector<1x128xf32>
    %58 = arith.divf %56, %57 : vector<1x128xf32>
    %59 = vector.broadcast %51 : vector<1x128xf32> to vector<32x128xf32>
    %60 = arith.subf %45, %59 : vector<32x128xf32>
    %cst_24 = arith.constant 9.99999974E-6 : f32
    %61 = vector.broadcast %cst_24 : f32 to vector<1x128xf32>
    %62 = arith.addf %58, %61 : vector<1x128xf32>
    %63 = math.rsqrt %62 : vector<1x128xf32>
    %64 = vector.broadcast %63 : vector<1x128xf32> to vector<32x128xf32>
    %65 = arith.mulf %60, %64 : vector<32x128xf32>
    %66 = vector.broadcast %46 : vector<32x1xf32> to vector<32x128xf32>
    %67 = arith.mulf %65, %66 : vector<32x128xf32>
    %68 = vector.broadcast %47 : vector<32x1xf32> to vector<32x128xf32>
    %69 = arith.addf %67, %68 : vector<32x128xf32>
    %c512 = arith.constant 512 : index
    %c0_25 = arith.constant 0 : index
    %70 = vector.load %arg2[%c512, %c0_25] : memref<936x128xf32, #tpu.memory_space<vmem>>, vector<128x32xf32>
    %cst_26 = arith.constant dense<0.000000e+00> : vector<128x128xf32>
    %71 = tpu.matmul %70, %69, %cst_26 {dimension_numbers = #tpu.dot_dimension_numbers<[1], [0], [0], [1], [0, 0, 1, 1], [], []>} : vector<128x32xf32>, vector<32x128xf32>, vector<128x128xf32> -> vector<128x128xf32>
    %c640 = arith.constant 640 : index
    %c0_27 = arith.constant 0 : index
    %72 = vector.load %arg2[%c640, %c0_27] : memref<936x128xf32, #tpu.memory_space<vmem>>, vector<128x1xf32>
    %73 = vector.broadcast %72 : vector<128x1xf32> to vector<128x128xf32>
    %74 = arith.addf %71, %73 : vector<128x128xf32>
    %75 = vector.extract_strided_slice %74 {offsets = [0, 0], sizes = [64, 128], strides = [1, 1]} : vector<128x128xf32> to vector<64x128xf32>
    %76 = vector.extract_strided_slice %74 {offsets = [64, 0], sizes = [64, 128], strides = [1, 1]} : vector<128x128xf32> to vector<64x128xf32>
    %cst_28 = arith.constant 0.000000e+00 : f32
    %77 = vector.broadcast %cst_28 : f32 to vector<64x128xf32>
    %78 = arith.maximumf %76, %77 : vector<64x128xf32>
    %79 = arith.mulf %75, %78 : vector<64x128xf32>
    %c768 = arith.constant 768 : index
    %c0_29 = arith.constant 0 : index
    %80 = vector.load %arg2[%c768, %c0_29] : memref<936x128xf32, #tpu.memory_space<vmem>>, vector<32x64xf32>
    %cst_30 = arith.constant dense<0.000000e+00> : vector<32x128xf32>
    %81 = tpu.matmul %80, %79, %cst_30 {dimension_numbers = #tpu.dot_dimension_numbers<[1], [0], [0], [1], [0, 0, 1, 1], [], []>} : vector<32x64xf32>, vector<64x128xf32>, vector<32x128xf32> -> vector<32x128xf32>
    %c800 = arith.constant 800 : index
    %c0_31 = arith.constant 0 : index
    %82 = vector.load %arg2[%c800, %c0_31] : memref<936x128xf32, #tpu.memory_space<vmem>>, vector<32x1xf32>
    %83 = vector.broadcast %82 : vector<32x1xf32> to vector<32x128xf32>
    %84 = arith.addf %81, %83 : vector<32x128xf32>
    %85 = arith.addf %45, %84 : vector<32x128xf32>
    %c832 = arith.constant 832 : index
    %c0_32 = arith.constant 0 : index
    %86 = vector.load %arg2[%c832, %c0_32] : memref<936x128xf32, #tpu.memory_space<vmem>>, vector<32x1xf32>
    %c864 = arith.constant 864 : index
    %c0_33 = arith.constant 0 : index
    %87 = vector.load %arg2[%c864, %c0_33] : memref<936x128xf32, #tpu.memory_space<vmem>>, vector<32x1xf32>
    %cst_34 = arith.constant dense<0.000000e+00> : vector<128xf32>
    %88 = vector.multi_reduction <add>, %85, %cst_34 [0] : vector<32x128xf32> to vector<128xf32>
    %89 = vector.shape_cast %88 : vector<128xf32> to vector<1x128xf32>
    %cst_35 = arith.constant 3.200000e+01 : f32
    %90 = vector.broadcast %cst_35 : f32 to vector<1x128xf32>
    %91 = arith.divf %89, %90 : vector<1x128xf32>
    %92 = vector.broadcast %91 : vector<1x128xf32> to vector<32x128xf32>
    %93 = arith.subf %85, %92 : vector<32x128xf32>
    %94 = arith.mulf %93, %93 : vector<32x128xf32>
    %cst_36 = arith.constant dense<0.000000e+00> : vector<128xf32>
    %95 = vector.multi_reduction <add>, %94, %cst_36 [0] : vector<32x128xf32> to vector<128xf32>
    %96 = vector.shape_cast %95 : vector<128xf32> to vector<1x128xf32>
    %cst_37 = arith.constant 3.200000e+01 : f32
    %97 = vector.broadcast %cst_37 : f32 to vector<1x128xf32>
    %98 = arith.divf %96, %97 : vector<1x128xf32>
    %99 = vector.broadcast %91 : vector<1x128xf32> to vector<32x128xf32>
    %100 = arith.subf %85, %99 : vector<32x128xf32>
    %cst_38 = arith.constant 9.99999974E-6 : f32
    %101 = vector.broadcast %cst_38 : f32 to vector<1x128xf32>
    %102 = arith.addf %98, %101 : vector<1x128xf32>
    %103 = math.rsqrt %102 : vector<1x128xf32>
    %104 = vector.broadcast %103 : vector<1x128xf32> to vector<32x128xf32>
    %105 = arith.mulf %100, %104 : vector<32x128xf32>
    %106 = vector.broadcast %86 : vector<32x1xf32> to vector<32x128xf32>
    %107 = arith.mulf %105, %106 : vector<32x128xf32>
    %108 = vector.broadcast %87 : vector<32x1xf32> to vector<32x128xf32>
    %109 = arith.addf %107, %108 : vector<32x128xf32>
    %cst_39 = arith.constant 0.000000e+00 : f32
    %110 = vector.broadcast %cst_39 : f32 to vector<32x128xf32>
    %111 = arith.maximumf %109, %110 : vector<32x128xf32>
    %c896 = arith.constant 896 : index
    %c0_40 = arith.constant 0 : index
    %112 = vector.load %arg2[%c896, %c0_40] : memref<936x128xf32, #tpu.memory_space<vmem>>, vector<32x1xf32>
    %113 = vector.broadcast %112 : vector<32x1xf32> to vector<32x128xf32>
    %114 = arith.mulf %113, %111 : vector<32x128xf32>
    %cst_41 = arith.constant dense<0.000000e+00> : vector<128xf32>
    %115 = vector.multi_reduction <add>, %114, %cst_41 [0] : vector<32x128xf32> to vector<128xf32>
    %116 = vector.shape_cast %115 : vector<128xf32> to vector<1x128xf32>
    %c928 = arith.constant 928 : index
    %c0_42 = arith.constant 0 : index
    %117 = vector.load %arg2[%c928, %c0_42] : memref<936x128xf32, #tpu.memory_space<vmem>>, vector<1x1xf32>
    %118 = vector.broadcast %117 : vector<1x1xf32> to vector<1x128xf32>
    %119 = arith.addf %116, %118 : vector<1x128xf32>
    %c0_43 = arith.constant 0 : index
    %c0_44 = arith.constant 0 : index
    %120 = vector.load %arg3[%c0_43, %c0_44] : memref<1x128xf32, #tpu.memory_space<vmem>>, vector<1x128xf32>
    tpu.vector_store %arg3[%c0_43, %c0_44], %119 {strides = array<i32>} : memref<1x128xf32, #tpu.memory_space<vmem>>, vector<1x128xf32>,
    return
  }
  func.func @transform_0(%arg0: i32) -> (i32, i32) {
    %c0_i32 = arith.constant 0 : i32
    %c0_i32_0 = arith.constant 0 : i32
    return %c0_i32, %arg0 : i32, i32
  }
  func.func @transform_1(%arg0: i32) -> (i32, i32) {
    %c0_i32 = arith.constant 0 : i32
    %c0_i32_0 = arith.constant 0 : i32
    %c0_i32_1 = arith.constant 0 : i32
    return %c0_i32, %c0_i32_0 : i32, i32
  }
  func.func @transform_2(%arg0: i32) -> (i32, i32) {
    %c0_i32 = arith.constant 0 : i32
    %c0_i32_0 = arith.constant 0 : i32
    return %c0_i32, %arg0 : i32, i32
  }
}

</mosaic_0001>

<bundles_post_ra>
// kernel: tpu_custom_call.1
= control target key start
LH: loop header
LB: loop body
LE: loop exit
PB: predicated region body
PF: predicated region fallthrough
CT: control target
= control target key end

     0   :  { %7 = vsyncpa [#allocation3], 0  ;;  %s2428_s0 = inlined_call_operand.hbm [shape: f32[20,256], index: 0, kind: input, shape index: {}]   ;;  %s2429_s1 = inlined_call_operand.hbm [shape: f32[936,128], index: 1, kind: input, shape index: {}]   ;;  %s2430_s2 = inlined_call_operand.hbm [shape: f32[1,256], index: 2, kind: output, shape index: {}]  }
   0x1   :  { %9 = vsyncpa [#allocation3 + $0x1], 0 }
   0x2   :  { %10 = vsyncpa [#allocation6], 0 }
   0x3   :  { %11 = vsyncpa [#allocation4], 0 }
   0x4   :  { %13 = vsyncpa [#allocation4 + $0x1], 0  ;;  %s2140_s9 = smov 0   ;;  %s2142_s10 = smov 0  }
   0x5   :  { %s2144_s11 = smov 0   ;;  %s2146_s12 = smov 0  }
   0x6 LB: > { %s2161_s13 = sadd.s32 4294967295, %s2116_s12   ;;  %s1619_s14 = sadd.s32 4294967294, %s2116_s12   ;;  %s2116_s12 = sphi %s2146_s12, %s2454_s12   ;;  %s2112_s11 = sphi %s2144_s11, %s2453_s11   ;;  %s2108_s10 = sphi %s2142_s10, %s2452_s10   ;;  %s2104_s9 = sphi %s2140_s9, %s2451_s9  }
   0x7   : > { %s2165_s15 = sadd.s32 1, %s2116_s12   ;;  %s26_s16 = sadd.s32 1, %s2112_s11 }
   0x8   : > { %s23_s17 = ssub.s32 %s2116_s12, %s2165_s15  ;;  %p33_p0 = scmp.ne.s32.totalorder %s2112_s11, %s2108_s10 }
   0x9   : > { %p24_p1 = scmp.eq.s32.totalorder %s23_s17, 0  ;;  %p34_p2 = scmp.eq.s32.totalorder %s2116_s12, 0 }
   0xa   : > { %p39_p3 = scmp.ne.s32.totalorder %s2108_s10, %s2104_s9  ;;  %p2431_p4 = scmp.eq.s32.totalorder %s2161_s13, 0 }
   0xb   : > { %s2177_s18 = scalar_select %p24_p1, %s2112_s11, %s26_s16  }
   0xc   : > { %p2179_p5 = por %p34_p2, %p33_p0  ;;  %p2185_p6 = por %p2431_p4, %p39_p3 }
   0xd   : > { %p84_p7 = scmp.eq.s32.totalorder %s2161_s13, 1  ;;  %p90_p8 = scmp.eq.s32.totalorder %s1619_s14, 1 }
   0xe   : > { %s2435_s19 = scalar_select %p2179_p5, 1, 0 }
   0xf   : > { %s2436_s20 = scalar_select %p2185_p6, 1, 0 }
  0x10   : > { %p1620_p9 = scmp.ge.s32.totalorder %s2116_s12, 1  ;;  %p97_p10 = scmp.lt.s32.totalorder %s2116_s12, 3 }
  0x11   : > { %p2192_p11 = por %p84_p7, %p33_p0  ;;  %p2196_p12 = por %p90_p8, %p39_p3 }
  0x12   : > { %p2200_p13 = pnand %p1620_p9, %p97_p10  ;;  %s2118_s24 = smov [#allocation5]  }
  0x13   : > { %s2437_s21 = scalar_select %p2192_p11, 1, 0 }
  0x14   : > { %s2438_s22 = scalar_select %p2196_p12, 1, 0 }
  0x15   : > { %s2439_s23 = scalar_select %p2200_p13, 1, 0 }
  0x16   : > { %p1927_p1 = pneg %p2200_p13  ;;  %s109_s25 = sshll.u32 %s2118_s24, 4  ;;  %s110_s25 = int_to_ptr.vmem [resolvable:$true] %s109_s25 }
  0x17   : > { %s123_s27 = sand.u32 1, %s2112_s11   ;;  %s1988_s30 = scalar_lea.hbm %s2429_s1, 14976 }
  0x18   : > { %p2208_p2 = pnand %p1927_p1, %p2431_p4  ;;  %p1989_p7 = scmp.ne.s32.totalorder %s2429_s1, %s1988_s30 }
  0x19   : > { %p1995_p1 = scmp.lt.u32.totalorder %s1988_s30, %s2429_s1 }
  0x1a   : > { %p1990_p8 = pneg %p2208_p2 }
  0x1c   : > { %p1991_p9 = pnand %p1990_p8, %p1989_p7 }
  0x1e   : > { %p1992_p10 = pneg %p1991_p9 }
  0x20   : > { %p1997_p4 = pnand %p1995_p1, %p1992_p10 }
  0x22   : > { %2000 = shalt.err (!%p1997_p4)
}
  0x23   : > { %s2001_s7 = scalar_lea.vmem %s110_s25, 14976  ;;  %p2009_p11 = scmp.lt.s32.totalorder %s110_s25, %s110_s25 }
  0x24   : > { %p2002_p0 = scmp.ne.s32.totalorder %s110_s25, %s2001_s7  ;;  %p2010_p6 = scmp.lt.s32.totalorder %s2001_s7, %s2001_s7 }
  0x26   : > { %p2004_p3 = pnand %p2002_p0, %p1990_p8  ;;  %p2011_p13 = por %p2010_p6, %p2009_p11 }
  0x28   : > { %p2005_p12 = pneg %p2004_p3 }
  0x2a   : > { %p2012_p5 = pnand %p2011_p13, %p2005_p12 }
  0x2c   : > { %2015 = shalt.err (!%p2012_p5)
}
  0x2d   : > { %s2119_s8 = smov 128   ;;  %s2120_s14 = smov 8  }
  0x2e   : > { %1930 = dma.hbm_to_vmem [thread:$0]  (!%p2208_p2), %s2429_s1, 14976, %s110_s25, [#allocation6], %s2119_s8, %s2119_s8, %s2120_s14  }
  0x2f   : > { %p2441_p4 = scmp.ne.s32.totalorder %s2435_s19, 0  ;;  %p2442_p0 = scmp.lt.s32.totalorder %s2116_s12, 2 }
  0x30   : > { %s1917_s28 = smul.u32 24, %s123_s27  ;;  %s1623_s29 = sshll.u32 %s2116_s12, 7 }
  0x31   : > { %p2238_p3 = pnand %p2442_p0, %p2441_p4  ;;  %s2246_s26 = scalar_lea.hbm %s2428_s0, %s1623_s29 }
  0x32   : > { %s127_s25 = scalar_lea.vmem [#allocation2], %s1917_s28  ;;  %s2250_s4 = scalar_lea.sflag [#allocation3], %s123_s27 }
  0x33   : > { %s133_s19 = sshll.u32 %s127_s25, 4  ;;  %s2016_s5 = scalar_lea.hbm %s2246_s26, 384  ;;  %s2248_s19 = int_to_ptr.vmem [resolvable:$true] %s133_s19 }
  0x34   : > { %p2017_p5 = scmp.ne.s32.totalorder %s2246_s26, %s2016_s5  ;;  %p2018_p6 = pneg %p2238_p3 }
  0x35   : > { %s2021_s16 = scalar_lea.hbm %s2428_s0, 768  ;;  %p2022_p13 = scmp.lt.u32.totalorder %s2246_s26, %s2428_s0 }
  0x36   : > { %p2019_p11 = pnand %p2018_p6, %p2017_p5  ;;  %p2023_p2 = scmp.lt.u32.totalorder %s2021_s16, %s2016_s5 }
  0x37   : > { %p2025_p8 = scmp.lt.u32.totalorder %s2016_s5, %s2246_s26 }
  0x38   : > { %p2020_p12 = pneg %p2019_p11  ;;  %p2024_p7 = por %p2023_p2, %p2022_p13 }
  0x3a   : > { %p2026_p9 = por %p2025_p8, %p2024_p7 }
  0x3c   : > { %p2027_p10 = pnand %p2026_p9, %p2020_p12 }
  0x3e   : > { %2030 = shalt.err (!%p2027_p10)
}
  0x3f   : > { %s2031_s27 = scalar_lea.vmem %s2248_s19, 384  ;;  %s2121_s28 = smov [#allocation2]  }
  0x40   : > { %p2032_p1 = scmp.ne.s32.totalorder %s2248_s19, %s2031_s27  ;;  %s2036_s30 = sshll.u32 %s2121_s28, 4  ;;  %s2037_s30 = int_to_ptr.vmem [resolvable:$false] %s2036_s30 }
  0x41   : > { %s2038_s3 = scalar_lea.vmem %s2037_s30, 768  ;;  %p2039_p5 = scmp.lt.s32.totalorder %s2248_s19, %s2037_s30 }
  0x42   : > { %p2034_p4 = pnand %p2032_p1, %p2018_p6  ;;  %p2040_p11 = scmp.lt.s32.totalorder %s2038_s3, %s2031_s27 }
  0x44   : > { %p2035_p0 = pneg %p2034_p4  ;;  %p2041_p13 = por %p2040_p11, %p2039_p5 }
  0x46   : > { %p2042_p2 = pnand %p2041_p13, %p2035_p0 }
  0x48   : > { %2045 = shalt.err (!%p2042_p2)
}
  0x49   : > { %s2122_s25 = smov 256   ;;  %p2444_p6 = scmp.ne.s32.totalorder %s2439_s23, 0 }
  0x4a   : > { %1934 = dma.hbm_to_vmem [thread:$0]  (!%p2238_p3), %s2246_s26, 384, %s2248_s19, %s2250_s4, %s2122_s25, %s2119_s8, %s2120_s14  }
  0x4b   : > { %145 = sbr.rel (%p2444_p6) target bundleno = 1505 (0x5e1), region = 28  ;;  %s2283_s5 = sand.u32 (!%p2444_p6), 1, %s2108_s10  }
  0x4c   : > { %s1918_s6 = smul.u32 (!%p2444_p6), 24, %s2283_s5  ;;  %s148_s7 = scalar_lea.sflag (!%p2444_p6), [#allocation3], %s2283_s5 }
  0x4d   : > { %p2445_p12 = scmp.ne.s32.totalorder (!%p2444_p6), %s2436_s20, 0 }
  0x4e   : > { %s151_s16 = scalar_lea.vmem (!%p2444_p6), [#allocation2], %s1918_s6 }
  0x52   : > { %2091 = dma.done.wait (%p2445_p12), %s148_s7, 384  }
  0x53   : > { %2093 = vsyncadd (%p2445_p12), %s148_s7, 4294966912  ;;  %p2446_p7 = scmp.eq.s32.totalorder %s2161_s13, 0 }
  0x55   : > { %2095 = dma.done.wait (%p2446_p7), [#allocation6], 14976   ;;  %p2447_p3 = pmov %p2446_p7 }
  0x56   : > { %v2123_v0 = vmov 0   ;;  %v184_v1 = vld [vmem:[#allocation5 + $0x30] sm:$0xff]  ;;  %v182_v2 = vld [vmem:[#allocation5 + $0x20] sm:$0xff]  ;;  %vm206_vm0 = vcmask 162816   ;;  %v185_v6 = vld [vmem:[#allocation5 + $0x38] sm:$0xff]  ;;  %vm219_vm1 = vcmask 1043456  }
  0x57   : > { %2097 = vsyncadd (%p2447_p3), [#allocation6], 4294952320  ;;  %1981 = vset.pattern.permute.xlu1 %v2123_v0  ;;  %1980 = vset.pattern.permute.xlu0 %v2123_v0  ;;  %v175_v3 = vld [vmem:[%s151_s16] sm:$0xff]  ;;  %v176_v4 = vld [vmem:[%s151_s16 + $0x8] sm:$0xff]  ;;  %vm511_vm2 = vcmask 261120   ;;  %vm749_vm3 = vcmask 523264  }
  0x58   : > { %198 = vperm.xlu1 %1981, %v184_v1   ;;  %188 = vperm.xlu0 %1980, %v182_v2   ;;  %v1865_v5 = vpack.c.bf16 %v176_v4, %v175_v3  ;;  %v178_v7 = vld [vmem:[#allocation5] sm:$0xff]  ;;  %v183_v8 = vld [vmem:[#allocation5 + $0x28] sm:$0xff]  ;;  %v180_v13 = vld [vmem:[#allocation5 + $0x10] sm:$0xff]  ;;  %s1671_s20 = sshll.u32 %s2161_s13, 4  ;;  %s174_s23 = scalar_lea.vmem [#allocation7], %s2283_s5 }
  0x59   : > { %v177_v9 = vld [vmem:[%s151_s16 + $0x10] sm:$0xf]  ;;  %1751 = vmatprep.mubr.msk.f32.mxu1 %vm206_vm0, %v178_v7  ;;  %v309_v10 = vld [vmem:[#allocation5 + $0x48] sm:$0xff]  ;;  %v310_v18 = vld [vmem:[#allocation5 + $0x50] sm:$0xff]  ;;  %s1543_s8 = sshll.u32 %s174_s23, 4  ;;  %s2384_s26 = scalar_lea.hbm %s2430_s2, %s1671_s20  ;;  %s2386_s8 = int_to_ptr.vmem [resolvable:$true] %s1543_s8 }
  0x5a   : > { %1866 = vmatprep.subr.bf16.mxu1 %v1865_v5  ;;  %v308_v11 = vld [vmem:[#allocation5 + $0x40] sm:$0xff]  ;;  %v179_v12 = vld [vmem:[#allocation5 + $0x8] sm:$0xff]  ;;  %v181_v16 = vld [vmem:[#allocation5 + $0x18] sm:$0xff]  ;;  %s1531_s19 = scalar_lea.sflag [#allocation4], %s2283_s5  ;;  %s2046_s4 = scalar_lea.vmem %s2386_s8, 16 }
  0x5b   : > { %1868 = vmatpush3.bf16.msra.mxu1 %v1865_v5  ;;  %v313_v14 = vld [vmem:[#allocation5 + $0x68] sm:$0xff]  ;;  %v312_v15 = vld [vmem:[#allocation5 + $0x60] sm:$0xff]  ;;  %v311_v17 = vld [vmem:[#allocation5 + $0x58] sm:$0xff]  ;;  %p2047_p8 = scmp.ne.s32.totalorder %s2386_s8, %s2046_s4  ;;  %p2448_p9 = scmp.ne.s32.totalorder %s2437_s21, 0 }
  0x5c   : > { %203 = vperm.xlu1 %1981, %v185_v6   ;;  %193 = vperm.xlu0 %1980, %v183_v8   ;;  %v315_v19 = vld [vmem:[#allocation5 + $0x78] sm:$0xff]  ;;  %v314_v20 = vld [vmem:[#allocation5 + $0x70] sm:$0xff]  ;;  %v424_v21 = vld [vmem:[#allocation5 + $0x148] sm:$0xff]  ;;  %s2124_s13 = smov [#allocation7]  }
  0x5d   : > { %1749 = vmatprep.subr.msk.mxu1 %vm219_vm1, %v177_v9  ;;  %v423_v22 = vld [vmem:[#allocation5 + $0x140] sm:$0xff]  ;;  %v416_v23 = vld [vmem:[#allocation5 + $0x108] sm:$0xff]  ;;  %v426_v25 = vld [vmem:[#allocation5 + $0x158] sm:$0xff]  ;;  %p2048_p10 = pnand %p2047_p8, %p2448_p9  ;;  %s2050_s17 = sshll.u32 %s2124_s13, 4  ;;  %s2051_s17 = int_to_ptr.vmem [resolvable:$false] %s2050_s17 }
  0x5e   : > { %v415_v24 = vld [vmem:[#allocation5 + $0x100] sm:$0xff]  ;;  %v425_v26 = vld [vmem:[#allocation5 + $0x150] sm:$0xff]  ;;  %v418_v27 = vld [vmem:[#allocation5 + $0x118] sm:$0xff]  ;;  %s2052_s29 = scalar_lea.vmem %s2051_s17, 32  ;;  %p2053_p4 = scmp.lt.s32.totalorder %s2386_s8, %s2051_s17 }
  0x5f   : > { %1750 = vmatpush3.msk.msra.mxu1 %vm219_vm1, %v177_v9  ;;  %v417_v28 = vld [vmem:[#allocation5 + $0x110] sm:$0xff]  ;;  %v428_v29 = vld [vmem:[#allocation5 + $0x168] sm:$0xff]  ;;  %v427_v30 = vld [vmem:[#allocation5 + $0x160] sm:$0xff]  ;;  %p2049_p1 = pneg %p2048_p10  ;;  %p2054_p0 = scmp.lt.s32.totalorder %s2052_s29, %s2046_s4 }
  0x60   : > { %358 = vperm.xlu1 %1981, %v309_v10   ;;  %353 = vperm.xlu0 %1980, %v308_v11   ;;  %v420_v31 = vld [vmem:[#allocation5 + $0x128] sm:$0xff]  ;;  %v419_v32 = vld [vmem:[#allocation5 + $0x120] sm:$0xff]  ;;  %v430_v33 = vld [vmem:[#allocation5 + $0x178] sm:$0xff] }
  0x61   : > { %1752 = vmatmul.mubr.msk.f32.vlgmr.msra.gmra.mrb[0].mxu1 %vm206_vm0, %v179_v12  ;;  %v429_v34 = vld [vmem:[#allocation5 + $0x170] sm:$0xff]  ;;  %v422_v35 = vld [vmem:[#allocation5 + $0x138] sm:$0xff]  ;;  %v726_v37 = vld [vmem:[#allocation5 + $0x1a8] sm:$0xff]  ;;  %p2055_p5 = por %p2054_p0, %p2053_p4 }
  0x62   : > { %1754 = vmatprep.mubr.msk.f32.mxu1 %vm206_vm0, %v180_v13  ;;  %v421_v36 = vld [vmem:[#allocation5 + $0x130] sm:$0xff]  ;;  %v725_v38 = vld [vmem:[#allocation5 + $0x1a0] sm:$0xff]  ;;  %v728_v39 = vld [vmem:[#allocation5 + $0x1b8] sm:$0xff] }
  0x63   : > { %v727_v40 = vld [vmem:[#allocation5 + $0x1b0] sm:$0xff]  ;;  %v852_v41 = vld [vmem:[#allocation5 + $0x1c8] sm:$0xff]  ;;  %v851_v42 = vld [vmem:[#allocation5 + $0x1c0] sm:$0xff]  ;;  %p2056_p11 = pnand %p2055_p5, %p2049_p1 }
  0x64   : > { %382 = vperm.xlu1 %1981, %v313_v14   ;;  %377 = vperm.xlu0 %1980, %v312_v15   ;;  %v856_v43 = vld [vmem:[#allocation5 + $0x1e8] sm:$0xff]  ;;  %v855_v44 = vld [vmem:[#allocation5 + $0x1e0] sm:$0xff]  ;;  %v854_v45 = vld [vmem:[#allocation5 + $0x1d8] sm:$0xff] }
  0x65   : > { %1755 = vmatmul.mubr.msk.f32.gmra.mrb[2].mxu1 %vm206_vm0, %v181_v16  ;;  %v853_v46 = vld [vmem:[#allocation5 + $0x1d0] sm:$0xff]  ;;  %v858_v47 = vld [vmem:[#allocation5 + $0x1f8] sm:$0xff]  ;;  %v966_v49 = vld [vmem:[#allocation5 + $0x2c8] sm:$0xff] }
  0x66   : > { %v857_v48 = vld [vmem:[#allocation5 + $0x1f0] sm:$0xff]  ;;  %v965_v50 = vld [vmem:[#allocation5 + $0x2c0] sm:$0xff]  ;;  %v958_v51 = vld [vmem:[#allocation5 + $0x288] sm:$0xff] }
  0x67   : > { %v957_v52 = vld [vmem:[#allocation5 + $0x280] sm:$0xff]  ;;  %v968_v53 = vld [vmem:[#allocation5 + $0x2d8] sm:$0xff]  ;;  %v967_v54 = vld [vmem:[#allocation5 + $0x2d0] sm:$0xff] }
  0x68   : > { %368 = vperm.xlu1 %1981, %v311_v17   ;;  %363 = vperm.xlu0 %1980, %v310_v18   ;;  %v960_v55 = vld [vmem:[#allocation5 + $0x298] sm:$0xff]  ;;  %v959_v56 = vld [vmem:[#allocation5 + $0x290] sm:$0xff]  ;;  %v970_v57 = vld [vmem:[#allocation5 + $0x2e8] sm:$0xff] }
  0x69   : > { %v969_v58 = vld [vmem:[#allocation5 + $0x2e0] sm:$0xff]  ;;  %v962_v59 = vld [vmem:[#allocation5 + $0x2a8] sm:$0xff]  ;;  %v972_v61 = vld [vmem:[#allocation5 + $0x2f8] sm:$0xff] }
  0x6a   : > { %v961_v60 = vld [vmem:[#allocation5 + $0x2a0] sm:$0xff]  ;;  %v971_v62 = vld [vmem:[#allocation5 + $0x2f0] sm:$0xff]  ;;  %v964_v63 = vld [vmem:[#allocation5 + $0x2b8] sm:$0xff] }
  0x6b   : > { %v963_v0 = vld [vmem:[#allocation5 + $0x2b0] sm:$0xff]  ;;  %v1267_v1 = vld [vmem:[#allocation5 + $0x328] sm:$0xff]  ;;  %v1266_v2 = vld [vmem:[#allocation5 + $0x320] sm:$0xff] }
  0x6c   : > { %392 = vperm.xlu1 %1981, %v315_v19   ;;  %387 = vperm.xlu0 %1980, %v314_v20   ;;  %v1269_v3 = vld [vmem:[#allocation5 + $0x338] sm:$0xff]  ;;  %v1268_v4 = vld [vmem:[#allocation5 + $0x330] sm:$0xff]  ;;  %v1392_v5 = vld [vmem:[#allocation5 + $0x348] sm:$0xff] }
  0x6d   : > { %v1391_v6 = vld [vmem:[#allocation5 + $0x340] sm:$0xff]  ;;  %v1393_v8 = vld [vmem:[#allocation5 + $0x350] sm:$0xff]  ;;  %v1394_v9 = vld [vmem:[#allocation5 + $0x358] sm:$0xff] }
  0x6e   : > { %v1395_v7 = vld [vmem:[#allocation5 + $0x360] sm:$0xff]  ;;  %v1396_v10 = vld [vmem:[#allocation5 + $0x368] sm:$0xff]  ;;  %v1398_v11 = vld [vmem:[#allocation5 + $0x378] sm:$0xff] }
  0x6f   : > { %v1397_v12 = vld [vmem:[#allocation5 + $0x370] sm:$0xff]  ;;  %v1486_v13 = vld [vmem:[#allocation5 + $0x388] sm:$0xff]  ;;  %v1485_v14 = vld [vmem:[#allocation5 + $0x380] sm:$0xff] }
  0x70   : > { %478 = vperm.xlu1 %1981, %v424_v21   ;;  %473 = vperm.xlu0 %1980, %v423_v22   ;;  %v1488_v15 = vld [vmem:[#allocation5 + $0x398] sm:$0xff]  ;;  %v1487_v16 = vld [vmem:[#allocation5 + $0x390] sm:$0xff]  ;;  %v1522_v17 = vld [vmem:[#allocation5 + $0x3a0] sm:$0x1] }
  0x71   : > { %v399_v18 = vld [vmem:[#allocation5 + $0x80] sm:$0xff] }
  0x72   : > { %1765 = vmatprep.mubr.msk.f32.mxu1 %vm511_vm2, %v399_v18 }
  0x74   : > { %438 = vperm.xlu1 %1981, %v416_v23   ;;  %433 = vperm.xlu0 %1980, %v415_v24  }
  0x78   : > { %488 = vperm.xlu1 %1981, %v426_v25   ;;  %483 = vperm.xlu0 %1980, %v425_v26  }
  0x7c   : > { %448 = vperm.xlu1 %1981, %v418_v27   ;;  %443 = vperm.xlu0 %1980, %v417_v28  }
  0x80   : > { %498 = vperm.xlu1 %1981, %v428_v29   ;;  %493 = vperm.xlu0 %1980, %v427_v30  }
  0x84   : > { %458 = vperm.xlu1 %1981, %v420_v31   ;;  %453 = vperm.xlu0 %1980, %v419_v32  }
  0x88   : > { %508 = vperm.xlu1 %1981, %v430_v33   ;;  %503 = vperm.xlu0 %1980, %v429_v34  }
  0x8c   : > { %468 = vperm.xlu1 %1981, %v422_v35   ;;  %463 = vperm.xlu0 %1980, %v421_v36  }
  0x90   : > { %736 = vperm.xlu1 %1981, %v726_v37   ;;  %731 = vperm.xlu0 %1980, %v725_v38  }
  0x94   : > { %746 = vperm.xlu1 %1981, %v728_v39   ;;  %741 = vperm.xlu0 %1980, %v727_v40  }
  0x98   : > { %900 = vperm.xlu1 %1981, %v852_v41   ;;  %895 = vperm.xlu0 %1980, %v851_v42  }
  0x9c   : > { %924 = vperm.xlu1 %1981, %v856_v43   ;;  %919 = vperm.xlu0 %1980, %v855_v44  }
  0xa0   : > { %910 = vperm.xlu1 %1981, %v854_v45   ;;  %905 = vperm.xlu0 %1980, %v853_v46  }
  0xa4   : > { %934 = vperm.xlu1 %1981, %v858_v47   ;;  %929 = vperm.xlu0 %1980, %v857_v48  }
  0xa8   : > { %1020 = vperm.xlu1 %1981, %v966_v49   ;;  %1015 = vperm.xlu0 %1980, %v965_v50  }
  0xac   : > { %980 = vperm.xlu1 %1981, %v958_v51   ;;  %975 = vperm.xlu0 %1980, %v957_v52  }
  0xb0   : > { %1030 = vperm.xlu1 %1981, %v968_v53   ;;  %1025 = vperm.xlu0 %1980, %v967_v54  }
  0xb4   : > { %990 = vperm.xlu1 %1981, %v960_v55   ;;  %985 = vperm.xlu0 %1980, %v959_v56  }
  0xb8   : > { %1040 = vperm.xlu1 %1981, %v970_v57   ;;  %1035 = vperm.xlu0 %1980, %v969_v58  }
  0xbc   : > { %1000 = vperm.xlu1 %1981, %v962_v59   ;;  %995 = vperm.xlu0 %1980, %v961_v60  }
  0xc0   : > { %1050 = vperm.xlu1 %1981, %v972_v61   ;;  %1045 = vperm.xlu0 %1980, %v971_v62  }
  0xc4   : > { %1010 = vperm.xlu1 %1981, %v964_v63   ;;  %1005 = vperm.xlu0 %1980, %v963_v0  }
  0xc8   : > { %1277 = vperm.xlu1 %1981, %v1267_v1   ;;  %1272 = vperm.xlu0 %1980, %v1266_v2  }
  0xcc   : > { %1287 = vperm.xlu1 %1981, %v1269_v3   ;;  %1282 = vperm.xlu0 %1980, %v1268_v4  }
  0xd0   : > { %1440 = vperm.xlu1 %1981, %v1392_v5   ;;  %1435 = vperm.xlu0 %1980, %v1391_v6  }
  0xd4   : > { %1459 = vperm.xlu1 %1981, %v1395_v7   ;;  %1445 = vperm.xlu0 %1980, %v1393_v8  }
  0xd7   : > { %v189_v19 = vpop.permute.xlu0 %188  ;;  %v199_v20 = vpop.permute.xlu1 %198 }
  0xd8   : > { %1450 = vperm.xlu1 %1981, %v1394_v9   ;;  %1464 = vperm.xlu0 %1980, %v1396_v10  }
  0xdb   : > { %v194_v22 = vpop.permute.xlu0 %193  ;;  %v204_v30 = vpop.permute.xlu1 %203 }
  0xdc   : > { %1474 = vperm.xlu1 %1981, %v1398_v11   ;;  %1469 = vperm.xlu0 %1980, %v1397_v12  }
  0xdf   : > { %v359_v58 = vpop.permute.xlu1 %358  ;;  %v354_v59 = vpop.permute.xlu0 %353 }
  0xe0   : > { %1496 = vperm.xlu1 %1981, %v1486_v13   ;;  %1491 = vperm.xlu0 %1980, %v1485_v14  }
  0xe3   : > { %v383_v62 = vpop.permute.xlu1 %382  ;;  %v378_v63 = vpop.permute.xlu0 %377 }
  0xe4   : > { %1506 = vperm.xlu1 %1981, %v1488_v15   ;;  %1501 = vperm.xlu0 %1980, %v1487_v16  }
  0xe7   : > { %v369_v0 = vpop.permute.xlu1 %368  ;;  %v364_v1 = vpop.permute.xlu0 %363 }
  0xe8   : > { %1525 = vperm.xlu0 %1980, %v1522_v17  }
  0xeb   : > { %v393_v11 = vpop.permute.xlu1 %392  ;;  %v388_v12 = vpop.permute.xlu0 %387 }
 0x134   : > { %v1753_v21 = vpop.f32.mrb[0].mxu1 }
 0x135   : > { %v289_v23 = vpop.f32.mrb[1].mxu1  ;;  %v2300_v24 = vadd.f32 %v1753_v21, %v194_v22  ;;  %v402_v21 = vld [vmem:[#allocation5 + $0x98] sm:$0xff]  ;;  %v403_v22 = vld [vmem:[#allocation5 + $0xa0] sm:$0xff] }
 0x136   : > { %v2302_v25 = vadd.f32 %v289_v23, %v189_v19  ;;  %v400_v19 = vld [vmem:[#allocation5 + $0x88] sm:$0xff] }
 0x137   : > { %v404_v23 = vld [vmem:[#allocation5 + $0xa8] sm:$0xff] }
 0x138   : > { %v1756_v26 = vpop.f32.mrb[2].mxu1  ;;  %v316_v28 = vadd.f32 %v2300_v24, %v2302_v25 }
 0x139   : > { %v299_v27 = vpop.f32.mrb[3].mxu1  ;;  %v2308_v31 = vadd.f32 %v1756_v26, %v204_v30  ;;  %v405_v26 = vld [vmem:[#allocation5 + $0xb0] sm:$0xff]  ;;  %v408_v30 = vld [vmem:[#allocation5 + $0xc8] sm:$0xff] }
 0x13a   : > { %v2306_v29 = vadd.f32 %v299_v27, %v199_v20  ;;  %v401_v20 = vld [vmem:[#allocation5 + $0x90] sm:$0xff]  ;;  %v406_v27 = vld [vmem:[#allocation5 + $0xb8] sm:$0xff] }
 0x13c   : > { %v317_v32 = vadd.f32 %v316_v28, %v2306_v29  ;;  %v407_v28 = vld [vmem:[#allocation5 + $0xc0] sm:$0xff] }
 0x13e   : > { %v318_v33 = vadd.f32 %v317_v32, %v2308_v31  ;;  %v409_v32 = vld [vmem:[#allocation5 + $0xd0] sm:$0xff] }
 0x140   : > { %v319_v34 = vrot.slane %v318_v33, 4 }
 0x142   : > { %v320_v35 = vadd.f32 %v319_v34, %v318_v33  ;;  %v410_v33 = vld [vmem:[#allocation5 + $0xd8] sm:$0xff]  ;;  %v411_v34 = vld [vmem:[#allocation5 + $0xe0] sm:$0xff] }
 0x144   : > { %v321_v36 = vrot.slane %v320_v35, 2 }
 0x146   : > { %v322_v37 = vadd.f32 %v321_v36, %v320_v35  ;;  %v412_v35 = vld [vmem:[#allocation5 + $0xe8] sm:$0xff]  ;;  %v413_v36 = vld [vmem:[#allocation5 + $0xf0] sm:$0xff] }
 0x148   : > { %v323_v38 = vrot.slane %v322_v37, 1 }
 0x14a   : > { %v324_v39 = vadd.f32 %v323_v38, %v322_v37  ;;  %v414_v37 = vld [vmem:[#allocation5 + $0xf8] sm:$0xff]  ;;  %v721_v38 = vld [vmem:[#allocation5 + $0x180] sm:$0xff] }
 0x14b   : > { %1805 = vmatprep.mubr.msk.f32.mxu0 %vm749_vm3, %v721_v38 }
 0x14c   : > { %v326_v40 = vmul.f32 0.03125, %v324_v39  ;;  %v479_v39 = vpop.permute.xlu1 %478 }
 0x14e   : > { %v327_v41 = vsub.f32 %v2302_v25, %v326_v40  ;;  %v328_v42 = vsub.f32 %v2300_v24, %v326_v40  ;;  %v329_v43 = vsub.f32 %v2306_v29, %v326_v40  ;;  %v330_v44 = vsub.f32 %v2308_v31, %v326_v40  ;;  %v474_v40 = vpop.permute.xlu0 %473 }
 0x150   : > { %v331_v45 = vmul.f32 %v327_v41, %v327_v41  ;;  %v332_v46 = vmul.f32 %v328_v42, %v328_v42  ;;  %v333_v47 = vmul.f32 %v329_v43, %v329_v43  ;;  %v334_v49 = vmul.f32 %v330_v44, %v330_v44 }
 0x152   : > { %v335_v48 = vadd.f32 %v332_v46, %v331_v45 }
 0x154   : > { %v336_v50 = vadd.f32 %v335_v48, %v333_v47 }
 0x156   : > { %v337_v51 = vadd.f32 %v336_v50, %v334_v49 }
 0x158   : > { %v338_v52 = vrot.slane %v337_v51, 4 }
 0x15a   : > { %v339_v53 = vadd.f32 %v338_v52, %v337_v51 }
 0x15c   : > { %v340_v54 = vrot.slane %v339_v53, 2 }
 0x15e   : > { %v341_v55 = vadd.f32 %v340_v54, %v339_v53 }
 0x160   : > { %v342_v56 = vrot.slane %v341_v55, 1 }
 0x162   : > { %v343_v57 = vadd.f32 %v342_v56, %v341_v55 }
 0x164   : > { %v344_v60 = vmul.f32 0.03125, %v343_v57 }
 0x166   : > { %v345_v61 = vadd.f32 1e-05, %v344_v60 }
 0x168   : > { %1982 = vrsqrt.f32 %v345_v61 }
 0x172   : > { %v1983_v2 = vpop.eup %1982 }
 0x173   : > { %v349_v3 = vmul.f32 %v1983_v2, %v329_v43  ;;  %v347_v4 = vmul.f32 %v1983_v2, %v327_v41  ;;  %v348_v5 = vmul.f32 %v1983_v2, %v328_v42  ;;  %v350_v6 = vmul.f32 %v1983_v2, %v330_v44  ;;  %v439_v41 = vpop.permute.xlu1 %438  ;;  %v434_v42 = vpop.permute.xlu0 %433 }
 0x175   : > { %v371_v7 = vmul.f32 %v354_v59, %v347_v4  ;;  %v372_v8 = vmul.f32 %v359_v58, %v348_v5  ;;  %v373_v9 = vmul.f32 %v364_v1, %v349_v3  ;;  %v374_v10 = vmul.f32 %v369_v0, %v350_v6 }
 0x177   : > { %v395_v13 = vadd.f32 %v378_v63, %v371_v7  ;;  %v396_v14 = vadd.f32 %v383_v62, %v372_v8  ;;  %v397_v15 = vadd.f32 %v388_v12, %v373_v9  ;;  %v398_v16 = vadd.f32 %v393_v11, %v374_v10  ;;  %v489_v43 = vpop.permute.xlu1 %488  ;;  %v484_v45 = vpop.permute.xlu0 %483 }
 0x179   : > { %v1869_v17 = vpack.c.bf16 %v396_v14, %v395_v13  ;;  %v1873_v18 = vpack.c.bf16 %v398_v16, %v397_v15 }
 0x17b   : > { %1870 = vmatprep.subr.bf16.mxu1 %v1869_v17  ;;  %v449_v49 = vpop.permute.xlu1 %448  ;;  %v444_v50 = vpop.permute.xlu0 %443 }
 0x17c   : > { %1872 = vmatpush3.bf16.msra.mxu1 %v1869_v17 }
 0x17d   : > { %1874 = vmatprep.subr.bf16.mxu1 %v1873_v18 }
 0x17f   : > { %v499_v53 = vpop.permute.xlu1 %498  ;;  %v494_v55 = vpop.permute.xlu0 %493 }
 0x180   : > { %1876 = vmatpush3.bf16.msra.mxu1 %v1873_v18 }
 0x183   : > { %1766 = vmatmul.mubr.msk.f32.vlgmr.msra.gmra.mrb[4].mxu1 %vm511_vm2, %v400_v19  ;;  %v459_v60 = vpop.permute.xlu1 %458  ;;  %v454_v62 = vpop.permute.xlu0 %453 }
 0x184   : > { %1768 = vmatprep.mubr.msk.f32.mxu1 %vm511_vm2, %v401_v20 }
 0x187   : > { %1769 = vmatmul.mubr.msk.f32.gmra.mrb[6].mxu1 %vm511_vm2, %v402_v21  ;;  %v509_v11 = vpop.permute.xlu1 %508  ;;  %v504_v16 = vpop.permute.xlu0 %503 }
 0x188   : > { %1771 = vmatprep.mubr.msk.f32.mxu1 %vm511_vm2, %v403_v22 }
 0x18b   : > { %1772 = vmatmul.mubr.msk.f32.gmra.mrb[8].mxu1 %vm511_vm2, %v404_v23  ;;  %v464_v38 = vpop.permute.xlu0 %463 }
 0x18c   : > { %1774 = vmatprep.mubr.msk.f32.mxu1 %vm511_vm2, %v405_v26 }
 0x18f   : > { %1775 = vmatmul.mubr.msk.f32.gmra.mrb[10].mxu1 %vm511_vm2, %v406_v27 }
 0x190   : > { %1777 = vmatprep.mubr.msk.f32.mxu1 %vm511_vm2, %v407_v28 }
 0x193   : > { %1778 = vmatmul.mubr.msk.f32.gmra.mrb[12].mxu1 %vm511_vm2, %v408_v30 }
 0x194   : > { %1780 = vmatprep.mubr.msk.f32.mxu1 %vm511_vm2, %v409_v32 }
 0x197   : > { %1781 = vmatmul.mubr.msk.f32.gmra.mrb[14].mxu1 %vm511_vm2, %v410_v33 }
 0x198   : > { %1783 = vmatprep.mubr.msk.f32.mxu1 %vm511_vm2, %v411_v34 }
 0x19b   : > { %1784 = vmatmul.mubr.msk.f32.gmra.mrb[16].mxu1 %vm511_vm2, %v412_v35  ;;  %v469_v35 = vpop.permute.xlu1 %468 }
 0x19c   : > { %1786 = vmatprep.mubr.msk.f32.mxu1 %vm511_vm2, %v413_v36 }
 0x19f   : > { %1787 = vmatmul.mubr.msk.f32.gmra.mrb[18].mxu1 %vm511_vm2, %v414_v37 }
 0x256   : > { %v1767_v44 = vpop.f32.mrb[4].mxu1 }
 0x257   : > { %v626_v46 = vpop.f32.mrb[5].mxu1  ;;  %v632_v63 = vadd.f32 %v1767_v44, %v439_v41 }
 0x258   : > { %v627_v1 = vadd.f32 %v626_v46, %v434_v42 }
 0x25a   : > { %v1770_v47 = vpop.f32.mrb[6].mxu1 }
 0x25b   : > { %v636_v48 = vpop.f32.mrb[7].mxu1  ;;  %v642_v9 = vadd.f32 %v1770_v47, %v449_v49  ;;  %v722_v47 = vld [vmem:[#allocation5 + $0x188] sm:$0xff]  ;;  %v724_v49 = vld [vmem:[#allocation5 + $0x198] sm:$0xff] }
 0x25c   : > { %v637_v12 = vadd.f32 %v636_v48, %v444_v50  ;;  %v723_v48 = vld [vmem:[#allocation5 + $0x190] sm:$0xff]  ;;  %v941_v50 = vld [vmem:[#allocation5 + $0x200] sm:$0xff] }
 0x25e   : > { %v1773_v51 = vpop.f32.mrb[8].mxu1 }
 0x25f   : > { %v646_v52 = vpop.f32.mrb[9].mxu1  ;;  %v652_v22 = vadd.f32 %v1773_v51, %v459_v60  ;;  %v737_v51 = vpop.permute.xlu1 %736 }
 0x260   : > { %v647_v26 = vadd.f32 %v646_v52, %v454_v62  ;;  %v732_v52 = vpop.permute.xlu0 %731 }
 0x262   : > { %v1776_v54 = vpop.f32.mrb[10].mxu1 }
 0x263   : > { %v656_v56 = vpop.f32.mrb[11].mxu1 }
 0x264   : > { %v657_v41 = vadd.f32 %v656_v56, %v464_v38 }
 0x266   : > { %v1779_v57 = vpop.f32.mrb[12].mxu1 }
 0x267   : > { %v672_v58 = vadd.f32 %v1779_v57, %v479_v39  ;;  %v666_v59 = vpop.f32.mrb[13].mxu1  ;;  %v662_v39 = vadd.f32 %v1776_v54, %v469_v35  ;;  %v747_v57 = vpop.permute.xlu1 %746 }
 0x268   : > { %v667_v61 = vadd.f32 %v666_v59, %v474_v40 }
 0x269   : > { %v706_v0 = vmax.f32 %v672_v58, 0.0 }
 0x26a   : > { %v705_v2 = vmax.f32 %v667_v61, 0.0  ;;  %v1782_v3 = vpop.f32.mrb[14].mxu1  ;;  %v742_v61 = vpop.permute.xlu0 %741 }
 0x26b   : > { %v714_v4 = vmul.f32 %v706_v0, %v632_v63  ;;  %v682_v5 = vadd.f32 %v1782_v3, %v489_v43  ;;  %v676_v6 = vpop.f32.mrb[15].mxu1 }
 0x26c   : > { %v713_v7 = vmul.f32 %v705_v2, %v627_v1  ;;  %v677_v8 = vadd.f32 %v676_v6, %v484_v45 }
 0x26d   : > { %v708_v10 = vmax.f32 %v682_v5, 0.0 }
 0x26e   : > { %v707_v13 = vmax.f32 %v677_v8, 0.0  ;;  %v1785_v14 = vpop.f32.mrb[16].mxu1  ;;  %v1877_v15 = vpack.c.bf16 %v714_v4, %v713_v7 }
 0x26f   : > { %v716_v17 = vmul.f32 %v708_v10, %v642_v9  ;;  %v692_v18 = vadd.f32 %v1785_v14, %v499_v53  ;;  %v686_v19 = vpop.f32.mrb[17].mxu1 }
 0x270   : > { %v715_v20 = vmul.f32 %v707_v13, %v637_v12  ;;  %v687_v21 = vadd.f32 %v686_v19, %v494_v55  ;;  %1878 = vmatprep.subr.bf16.mxu0 %v1877_v15 }
 0x271   : > { %v710_v23 = vmax.f32 %v692_v18, 0.0  ;;  %1880 = vmatpush3.bf16.msra.mxu0 %v1877_v15 }
 0x272   : > { %v709_v27 = vmax.f32 %v687_v21, 0.0  ;;  %v1788_v28 = vpop.f32.mrb[18].mxu1  ;;  %v1881_v30 = vpack.c.bf16 %v716_v17, %v715_v20 }
 0x273   : > { %v718_v32 = vmul.f32 %v710_v23, %v652_v22  ;;  %v702_v33 = vadd.f32 %v1788_v28, %v509_v11  ;;  %v696_v34 = vpop.f32.mrb[19].mxu1  ;;  %v901_v28 = vpop.permute.xlu1 %900 }
 0x274   : > { %v717_v36 = vmul.f32 %v709_v27, %v647_v26  ;;  %v697_v37 = vadd.f32 %v696_v34, %v504_v16  ;;  %1882 = vmatprep.subr.bf16.mxu0 %v1881_v30 }
 0x275   : > { %v712_v40 = vmax.f32 %v702_v33, 0.0  ;;  %1884 = vmatpush3.bf16.msra.mxu0 %v1881_v30  ;;  %v896_v30 = vpop.permute.xlu0 %895 }
 0x276   : > { %v711_v42 = vmax.f32 %v697_v37, 0.0  ;;  %v1885_v43 = vpack.c.bf16 %v718_v32, %v717_v36 }
 0x277   : > { %v720_v44 = vmul.f32 %v712_v40, %v662_v39  ;;  %v925_v34 = vpop.permute.xlu1 %924 }
 0x278   : > { %v719_v45 = vmul.f32 %v711_v42, %v657_v41  ;;  %1886 = vmatprep.subr.bf16.mxu0 %v1885_v43 }
 0x279   : > { %1888 = vmatpush3.bf16.msra.mxu0 %v1885_v43  ;;  %v920_v35 = vpop.permute.xlu0 %919 }
 0x27a   : > { %v1889_v46 = vpack.c.bf16 %v720_v44, %v719_v45 }
 0x27b   : > { %v911_v36 = vpop.permute.xlu1 %910 }
 0x27c   : > { %1890 = vmatprep.subr.bf16.mxu0 %v1889_v46 }
 0x27d   : > { %1892 = vmatpush3.bf16.msra.mxu0 %v1889_v46  ;;  %v906_v37 = vpop.permute.xlu0 %905 }
 0x280   : > { %1806 = vmatmul.mubr.msk.f32.vlgmr.msra.gmra.mrb[0].mxu0 %vm749_vm3, %v722_v47  ;;  %v935_v47 = vpop.permute.xlu1 %934 }
 0x281   : > { %1808 = vmatprep.mubr.msk.f32.mxu0 %vm749_vm3, %v723_v48  ;;  %v930_v48 = vpop.permute.xlu0 %929 }
 0x284   : > { %1809 = vmatmul.mubr.msk.f32.gmra.mrb[2].mxu0 %vm749_vm3, %v724_v49 }
 0x285   : > { %1819 = vmatprep.mubr.msk.f32.mxu0 %vm511_vm2, %v941_v50 }
 0x353   : > { %v1807_v53 = vpop.f32.mrb[0].mxu0 }
 0x354   : > { %v834_v54 = vadd.f32 %v1807_v53, %v737_v51  ;;  %v828_v55 = vpop.f32.mrb[1].mxu0 }
 0x355   : > { %v829_v56 = vadd.f32 %v828_v55, %v732_v52  ;;  %v942_v55 = vld [vmem:[#allocation5 + $0x208] sm:$0xff] }
 0x356   : > { %v2337_v58 = vadd.f32 %v834_v54, %v2300_v24 }
 0x357   : > { %v2340_v59 = vadd.f32 %v829_v56, %v2302_v25  ;;  %v1810_v60 = vpop.f32.mrb[2].mxu0  ;;  %v943_v56 = vld [vmem:[#allocation5 + $0x210] sm:$0xff] }
 0x358   : > { %v838_v62 = vpop.f32.mrb[3].mxu0  ;;  %v844_v63 = vadd.f32 %v1810_v60, %v747_v57  ;;  %v944_v57 = vld [vmem:[#allocation5 + $0x218] sm:$0xff]  ;;  %v945_v60 = vld [vmem:[#allocation5 + $0x220] sm:$0xff] }
 0x359   : > { %v839_v0 = vadd.f32 %v838_v62, %v742_v61  ;;  %v859_v1 = vadd.f32 %v2337_v58, %v2340_v59  ;;  %v946_v61 = vld [vmem:[#allocation5 + $0x228] sm:$0xff]  ;;  %v947_v62 = vld [vmem:[#allocation5 + $0x230] sm:$0xff] }
 0x35a   : > { %v2348_v3 = vadd.f32 %v844_v63, %v2308_v31  ;;  %v948_v63 = vld [vmem:[#allocation5 + $0x238] sm:$0xff] }
 0x35b   : > { %v2345_v2 = vadd.f32 %v839_v0, %v2306_v29  ;;  %v949_v0 = vld [vmem:[#allocation5 + $0x240] sm:$0xff] }
 0x35d   : > { %v860_v24 = vadd.f32 %v859_v1, %v2345_v2  ;;  %v950_v1 = vld [vmem:[#allocation5 + $0x248] sm:$0xff] }
 0x35f   : > { %v861_v4 = vadd.f32 %v860_v24, %v2348_v3  ;;  %v951_v24 = vld [vmem:[#allocation5 + $0x250] sm:$0xff] }
 0x361   : > { %v862_v25 = vrot.slane %v861_v4, 4 }
 0x363   : > { %v863_v5 = vadd.f32 %v862_v25, %v861_v4  ;;  %v952_v4 = vld [vmem:[#allocation5 + $0x258] sm:$0xff]  ;;  %v953_v25 = vld [vmem:[#allocation5 + $0x260] sm:$0xff] }
 0x365   : > { %v864_v6 = vrot.slane %v863_v5, 2 }
 0x367   : > { %v865_v7 = vadd.f32 %v864_v6, %v863_v5  ;;  %v954_v5 = vld [vmem:[#allocation5 + $0x268] sm:$0xff]  ;;  %v955_v6 = vld [vmem:[#allocation5 + $0x270] sm:$0xff] }
 0x369   : > { %v866_v8 = vrot.slane %v865_v7, 1 }
 0x36b   : > { %v867_v9 = vadd.f32 %v866_v8, %v865_v7  ;;  %v956_v7 = vld [vmem:[#allocation5 + $0x278] sm:$0xff]  ;;  %v1262_v8 = vld [vmem:[#allocation5 + $0x300] sm:$0xff] }
 0x36c   : > { %1859 = vmatprep.mubr.msk.f32.mxu1 %vm749_vm3, %v1262_v8 }
 0x36d   : > { %v868_v10 = vmul.f32 0.03125, %v867_v9  ;;  %v1021_v9 = vpop.permute.xlu1 %1020 }
 0x36f   : > { %v869_v11 = vsub.f32 %v2340_v59, %v868_v10  ;;  %v870_v12 = vsub.f32 %v2337_v58, %v868_v10  ;;  %v871_v29 = vsub.f32 %v2345_v2, %v868_v10  ;;  %v872_v31 = vsub.f32 %v2348_v3, %v868_v10  ;;  %v1016_v10 = vpop.permute.xlu0 %1015 }
 0x371   : > { %v873_v13 = vmul.f32 %v869_v11, %v869_v11  ;;  %v874_v14 = vmul.f32 %v870_v12, %v870_v12  ;;  %v875_v15 = vmul.f32 %v871_v29, %v871_v29  ;;  %v876_v17 = vmul.f32 %v872_v31, %v872_v31 }
 0x373   : > { %v877_v16 = vadd.f32 %v874_v14, %v873_v13 }
 0x375   : > { %v878_v18 = vadd.f32 %v877_v16, %v875_v15 }
 0x377   : > { %v879_v19 = vadd.f32 %v878_v18, %v876_v17 }
 0x379   : > { %v880_v20 = vrot.slane %v879_v19, 4 }
 0x37b   : > { %v881_v21 = vadd.f32 %v880_v20, %v879_v19 }
 0x37d   : > { %v882_v22 = vrot.slane %v881_v21, 2 }
 0x37f   : > { %v883_v23 = vadd.f32 %v882_v22, %v881_v21 }
 0x381   : > { %v884_v26 = vrot.slane %v883_v23, 1 }
 0x383   : > { %v885_v27 = vadd.f32 %v884_v26, %v883_v23 }
 0x385   : > { %v886_v32 = vmul.f32 0.03125, %v885_v27 }
 0x387   : > { %v887_v33 = vadd.f32 1e-05, %v886_v32 }
 0x389   : > { %1984 = vrsqrt.f32 %v887_v33 }
 0x393   : > { %v1985_v38 = vpop.eup %1984 }
 0x394   : > { %v891_v39 = vmul.f32 %v1985_v38, %v871_v29  ;;  %v889_v40 = vmul.f32 %v1985_v38, %v869_v11  ;;  %v890_v41 = vmul.f32 %v1985_v38, %v870_v12  ;;  %v892_v42 = vmul.f32 %v1985_v38, %v872_v31  ;;  %v981_v11 = vpop.permute.xlu1 %980  ;;  %v976_v12 = vpop.permute.xlu0 %975 }
 0x396   : > { %v913_v43 = vmul.f32 %v896_v30, %v889_v40  ;;  %v914_v44 = vmul.f32 %v901_v28, %v890_v41  ;;  %v915_v45 = vmul.f32 %v906_v37, %v891_v39  ;;  %v916_v46 = vmul.f32 %v911_v36, %v892_v42 }
 0x398   : > { %v937_v49 = vadd.f32 %v920_v35, %v913_v43  ;;  %v938_v50 = vadd.f32 %v925_v34, %v914_v44  ;;  %v939_v51 = vadd.f32 %v930_v48, %v915_v45  ;;  %v940_v52 = vadd.f32 %v935_v47, %v916_v46  ;;  %v1031_v29 = vpop.permute.xlu1 %1030  ;;  %v1026_v13 = vpop.permute.xlu0 %1025 }
 0x39a   : > { %v1893_v53 = vpack.c.bf16 %v938_v50, %v937_v49  ;;  %v1897_v54 = vpack.c.bf16 %v940_v52, %v939_v51 }
 0x39c   : > { %1894 = vmatprep.subr.bf16.mxu0 %v1893_v53  ;;  %v991_v17 = vpop.permute.xlu1 %990  ;;  %v986_v18 = vpop.permute.xlu0 %985 }
 0x39d   : > { %1896 = vmatpush3.bf16.msra.mxu0 %v1893_v53 }
 0x39e   : > { %1898 = vmatprep.subr.bf16.mxu0 %v1897_v54 }
 0x3a0   : > { %v1041_v21 = vpop.permute.xlu1 %1040  ;;  %v1036_v23 = vpop.permute.xlu0 %1035 }
 0x3a1   : > { %1900 = vmatpush3.bf16.msra.mxu0 %v1897_v54 }
 0x3a4   : > { %1820 = vmatmul.mubr.msk.f32.vlgmr.msra.gmra.mrb[4].mxu0 %vm511_vm2, %v942_v55  ;;  %v1001_v32 = vpop.permute.xlu1 %1000  ;;  %v996_v34 = vpop.permute.xlu0 %995 }
 0x3a5   : > { %1822 = vmatprep.mubr.msk.f32.mxu0 %vm511_vm2, %v943_v56 }
 0x3a8   : > { %1823 = vmatmul.mubr.msk.f32.gmra.mrb[6].mxu0 %vm511_vm2, %v944_v57  ;;  %v1051_v47 = vpop.permute.xlu1 %1050  ;;  %v1046_v52 = vpop.permute.xlu0 %1045 }
 0x3a9   : > { %1825 = vmatprep.mubr.msk.f32.mxu0 %vm511_vm2, %v945_v60 }
 0x3ac   : > { %1826 = vmatmul.mubr.msk.f32.gmra.mrb[8].mxu0 %vm511_vm2, %v946_v61  ;;  %v1006_v8 = vpop.permute.xlu0 %1005 }
 0x3ad   : > { %1828 = vmatprep.mubr.msk.f32.mxu0 %vm511_vm2, %v947_v62 }
 0x3b0   : > { %1829 = vmatmul.mubr.msk.f32.gmra.mrb[10].mxu0 %vm511_vm2, %v948_v63 }
 0x3b1   : > { %1831 = vmatprep.mubr.msk.f32.mxu0 %vm511_vm2, %v949_v0 }
 0x3b4   : > { %1832 = vmatmul.mubr.msk.f32.gmra.mrb[12].mxu0 %vm511_vm2, %v950_v1 }
 0x3b5   : > { %1834 = vmatprep.mubr.msk.f32.mxu0 %vm511_vm2, %v951_v24 }
 0x3b8   : > { %1835 = vmatmul.mubr.msk.f32.gmra.mrb[14].mxu0 %vm511_vm2, %v952_v4 }
 0x3b9   : > { %1837 = vmatprep.mubr.msk.f32.mxu0 %vm511_vm2, %v953_v25 }
 0x3bc   : > { %1838 = vmatmul.mubr.msk.f32.gmra.mrb[16].mxu0 %vm511_vm2, %v954_v5  ;;  %v1011_v5 = vpop.permute.xlu1 %1010 }
 0x3bd   : > { %1840 = vmatprep.mubr.msk.f32.mxu0 %vm511_vm2, %v955_v6 }
 0x3c0   : > { %1841 = vmatmul.mubr.msk.f32.gmra.mrb[18].mxu0 %vm511_vm2, %v956_v7 }
 0x477   : > { %v1821_v31 = vpop.f32.mrb[4].mxu0 }
 0x478   : > { %v1167_v14 = vpop.f32.mrb[5].mxu0  ;;  %v1173_v35 = vadd.f32 %v1821_v31, %v981_v11 }
 0x479   : > { %v1168_v37 = vadd.f32 %v1167_v14, %v976_v12 }
 0x47b   : > { %v1824_v15 = vpop.f32.mrb[6].mxu0 }
 0x47c   : > { %v1177_v16 = vpop.f32.mrb[7].mxu0  ;;  %v1183_v45 = vadd.f32 %v1824_v15, %v991_v17  ;;  %v1263_v15 = vld [vmem:[#allocation5 + $0x308] sm:$0xff]  ;;  %v1265_v17 = vld [vmem:[#allocation5 + $0x318] sm:$0xff] }
 0x47d   : > { %v1178_v48 = vadd.f32 %v1177_v16, %v986_v18  ;;  %v1264_v16 = vld [vmem:[#allocation5 + $0x310] sm:$0xff]  ;;  %v1278_v18 = vpop.permute.xlu1 %1277 }
 0x47f   : > { %v1827_v19 = vpop.f32.mrb[8].mxu0 }
 0x480   : > { %v1187_v20 = vpop.f32.mrb[9].mxu0  ;;  %v1193_v60 = vadd.f32 %v1827_v19, %v1001_v32  ;;  %v1273_v19 = vpop.permute.xlu0 %1272 }
 0x481   : > { %v1188_v62 = vadd.f32 %v1187_v20, %v996_v34 }
 0x483   : > { %v1830_v22 = vpop.f32.mrb[10].mxu0 }
 0x484   : > { %v1197_v26 = vpop.f32.mrb[11].mxu0  ;;  %v1283_v32 = vpop.permute.xlu0 %1282 }
 0x485   : > { %v1198_v11 = vadd.f32 %v1197_v26, %v1006_v8 }
 0x487   : > { %v1833_v27 = vpop.f32.mrb[12].mxu0 }
 0x488   : > { %v1213_v28 = vadd.f32 %v1833_v27, %v1021_v9  ;;  %v1207_v30 = vpop.f32.mrb[13].mxu0  ;;  %v1203_v9 = vadd.f32 %v1830_v22, %v1011_v5  ;;  %v1288_v27 = vpop.permute.xlu1 %1287 }
 0x489   : > { %v1208_v33 = vadd.f32 %v1207_v30, %v1016_v10 }
 0x48a   : > { %v1247_v36 = vmax.f32 %v1213_v28, 0.0 }
 0x48b   : > { %v1246_v38 = vmax.f32 %v1208_v33, 0.0  ;;  %v1836_v39 = vpop.f32.mrb[14].mxu0 }
 0x48c   : > { %v1255_v40 = vmul.f32 %v1247_v36, %v1173_v35  ;;  %v1223_v41 = vadd.f32 %v1836_v39, %v1031_v29  ;;  %v1217_v42 = vpop.f32.mrb[15].mxu0 }
 0x48d   : > { %v1254_v43 = vmul.f32 %v1246_v38, %v1168_v37  ;;  %v1218_v44 = vadd.f32 %v1217_v42, %v1026_v13 }
 0x48e   : > { %v1249_v46 = vmax.f32 %v1223_v41, 0.0 }
 0x48f   : > { %v1248_v49 = vmax.f32 %v1218_v44, 0.0  ;;  %v1839_v50 = vpop.f32.mrb[16].mxu0  ;;  %v1901_v51 = vpack.c.bf16 %v1255_v40, %v1254_v43 }
 0x490   : > { %v1257_v53 = vmul.f32 %v1249_v46, %v1183_v45  ;;  %v1233_v54 = vadd.f32 %v1839_v50, %v1041_v21  ;;  %v1227_v55 = vpop.f32.mrb[17].mxu0 }
 0x491   : > { %v1256_v56 = vmul.f32 %v1248_v49, %v1178_v48  ;;  %v1228_v57 = vadd.f32 %v1227_v55, %v1036_v23  ;;  %1902 = vmatprep.subr.bf16.mxu1 %v1901_v51 }
 0x492   : > { %v1251_v61 = vmax.f32 %v1233_v54, 0.0  ;;  %1904 = vmatpush3.bf16.msra.mxu1 %v1901_v51 }
 0x493   : > { %v1250_v63 = vmax.f32 %v1228_v57, 0.0  ;;  %v1842_v0 = vpop.f32.mrb[18].mxu0  ;;  %v1905_v1 = vpack.c.bf16 %v1257_v53, %v1256_v56 }
 0x494   : > { %v1259_v24 = vmul.f32 %v1251_v61, %v1193_v60  ;;  %v1243_v4 = vadd.f32 %v1842_v0, %v1051_v47  ;;  %v1237_v25 = vpop.f32.mrb[19].mxu0  ;;  %v1436_v60 = vpop.permute.xlu0 %1435 }
 0x495   : > { %v1258_v6 = vmul.f32 %v1250_v63, %v1188_v62  ;;  %v1238_v7 = vadd.f32 %v1237_v25, %v1046_v52  ;;  %1906 = vmatprep.subr.bf16.mxu1 %v1905_v1  ;;  %v1441_v62 = vpop.permute.xlu1 %1440 }
 0x496   : > { %v1253_v10 = vmax.f32 %v1243_v4, 0.0  ;;  %1908 = vmatpush3.bf16.msra.mxu1 %v1905_v1 }
 0x497   : > { %v1252_v12 = vmax.f32 %v1238_v7, 0.0  ;;  %v1909_v29 = vpack.c.bf16 %v1259_v24, %v1258_v6 }
 0x498   : > { %v1261_v31 = vmul.f32 %v1253_v10, %v1203_v9  ;;  %v1446_v1 = vpop.permute.xlu0 %1445 }
 0x499   : > { %v1260_v13 = vmul.f32 %v1252_v12, %v1198_v11  ;;  %1910 = vmatprep.subr.bf16.mxu1 %v1909_v29  ;;  %v1460_v4 = vpop.permute.xlu1 %1459 }
 0x49a   : > { %1912 = vmatpush3.bf16.msra.mxu1 %v1909_v29 }
 0x49b   : > { %v1913_v14 = vpack.c.bf16 %v1261_v31, %v1260_v13 }
 0x49c   : > { %v1465_v5 = vpop.permute.xlu0 %1464 }
 0x49d   : > { %1914 = vmatprep.subr.bf16.mxu1 %v1913_v14  ;;  %v1451_v6 = vpop.permute.xlu1 %1450 }
 0x49e   : > { %1916 = vmatpush3.bf16.msra.mxu1 %v1913_v14 }
 0x4a0   : > { %v1470_v7 = vpop.permute.xlu0 %1469 }
 0x4a1   : > { %1860 = vmatmul.mubr.msk.f32.vlgmr.msra.gmra.mrb[20].mxu1 %vm749_vm3, %v1263_v15  ;;  %v1475_v9 = vpop.permute.xlu1 %1474 }
 0x4a2   : > { %1862 = vmatprep.mubr.msk.f32.mxu1 %vm749_vm3, %v1264_v16 }
 0x4a4   : > { %v1492_v16 = vpop.permute.xlu0 %1491 }
 0x4a5   : > { %1863 = vmatmul.mubr.msk.f32.gmra.mrb[22].mxu1 %vm749_vm3, %v1265_v17 }
 0x574   : > { %v1861_v20 = vpop.f32.mrb[20].mxu1 }
 0x575   : > { %v1374_v21 = vadd.f32 %v1861_v20, %v1278_v18  ;;  %v1368_v22 = vpop.f32.mrb[21].mxu1 }
 0x576   : > { %v1369_v23 = vadd.f32 %v1368_v22, %v1273_v19 }
 0x577   : > { %v1388_v26 = vadd.f32 %v1374_v21, %v2337_v58  ;;  %v1497_v21 = vpop.permute.xlu1 %1496 }
 0x578   : > { %v1387_v28 = vadd.f32 %v1369_v23, %v2340_v59  ;;  %v1864_v30 = vpop.f32.mrb[22].mxu1 }
 0x579   : > { %v1378_v33 = vpop.f32.mrb[23].mxu1  ;;  %v1384_v35 = vadd.f32 %v1864_v30, %v1288_v27 }
 0x57a   : > { %v1399_v34 = vadd.f32 %v1388_v26, %v1387_v28  ;;  %v1379_v36 = vadd.f32 %v1378_v33, %v1283_v32  ;;  %v1502_v32 = vpop.permute.xlu0 %1501 }
 0x57b   : > { %v1390_v38 = vadd.f32 %v1384_v35, %v2348_v3  ;;  %v1507_v35 = vpop.permute.xlu1 %1506 }
 0x57c   : > { %v1389_v37 = vadd.f32 %v1379_v36, %v2345_v2 }
 0x57e   : > { %v1400_v39 = vadd.f32 %v1399_v34, %v1389_v37 }
 0x580   : > { %v1401_v40 = vadd.f32 %v1400_v39, %v1390_v38 }
 0x582   : > { %v1402_v41 = vrot.slane %v1401_v40, 4 }
 0x584   : > { %v1403_v42 = vadd.f32 %v1402_v41, %v1401_v40 }
 0x586   : > { %v1404_v43 = vrot.slane %v1403_v42, 2 }
 0x588   : > { %v1405_v44 = vadd.f32 %v1404_v43, %v1403_v42 }
 0x58a   : > { %v1406_v58 = vrot.slane %v1405_v44, 1 }
 0x58c   : > { %v1407_v45 = vadd.f32 %v1406_v58, %v1405_v44  ;;  %v1526_v58 = vpop.permute.xlu0 %1525 }
 0x58e   : > { %v1408_v46 = vmul.f32 0.03125, %v1407_v45 }
 0x590   : > { %v1409_v59 = vsub.f32 %v1387_v28, %v1408_v46  ;;  %v1410_v47 = vsub.f32 %v1388_v26, %v1408_v46  ;;  %v1411_v48 = vsub.f32 %v1389_v37, %v1408_v46  ;;  %v1412_v49 = vsub.f32 %v1390_v38, %v1408_v46 }
 0x592   : > { %v1413_v50 = vmul.f32 %v1409_v59, %v1409_v59  ;;  %v1414_v51 = vmul.f32 %v1410_v47, %v1410_v47  ;;  %v1415_v52 = vmul.f32 %v1411_v48, %v1411_v48  ;;  %v1416_v2 = vmul.f32 %v1412_v49, %v1412_v49 }
 0x594   : > { %v1417_v53 = vadd.f32 %v1414_v51, %v1413_v50 }
 0x596   : > { %v1418_v54 = vadd.f32 %v1417_v53, %v1415_v52 }
 0x598   : > { %v1419_v3 = vadd.f32 %v1418_v54, %v1416_v2 }
 0x59a   : > { %v1420_v55 = vrot.slane %v1419_v3, 4 }
 0x59c   : > { %v1421_v56 = vadd.f32 %v1420_v55, %v1419_v3 }
 0x59e   : > { %v1422_v57 = vrot.slane %v1421_v56, 2 }
 0x5a0   : > { %v1423_v61 = vadd.f32 %v1422_v57, %v1421_v56 }
 0x5a2   : > { %v1424_v63 = vrot.slane %v1423_v61, 1 }
 0x5a4   : > { %v1425_v0 = vadd.f32 %v1424_v63, %v1423_v61 }
 0x5a6   : > { %v1426_v24 = vmul.f32 0.03125, %v1425_v0 }
 0x5a8   : > { %v1427_v25 = vadd.f32 1e-05, %v1426_v24 }
 0x5aa   : > { %1986 = vrsqrt.f32 %v1427_v25 }
 0x5b4   : > { %v1987_v8 = vpop.eup %1986 }
 0x5b5   : > { %v1429_v10 = vmul.f32 %v1987_v8, %v1409_v59  ;;  %v1430_v11 = vmul.f32 %v1987_v8, %v1410_v47  ;;  %v1431_v12 = vmul.f32 %v1987_v8, %v1411_v48  ;;  %v1432_v29 = vmul.f32 %v1987_v8, %v1412_v49 }
 0x5b7   : > { %v1453_v31 = vmul.f32 %v1436_v60, %v1429_v10  ;;  %v1454_v13 = vmul.f32 %v1441_v62, %v1430_v11  ;;  %v1455_v14 = vmul.f32 %v1446_v1, %v1431_v12  ;;  %v1456_v15 = vmul.f32 %v1451_v6, %v1432_v29 }
 0x5b9   : > { %v1477_v17 = vadd.f32 %v1460_v4, %v1453_v31  ;;  %v1478_v18 = vadd.f32 %v1465_v5, %v1454_v13  ;;  %v1479_v19 = vadd.f32 %v1470_v7, %v1455_v14  ;;  %v1480_v20 = vadd.f32 %v1475_v9, %v1456_v15 }
 0x5bb   : > { %v1481_v22 = vmax.f32 %v1477_v17, 0.0  ;;  %v1482_v23 = vmax.f32 %v1478_v18, 0.0  ;;  %v1483_v26 = vmax.f32 %v1479_v19, 0.0  ;;  %v1484_v27 = vmax.f32 %v1480_v20, 0.0 }
 0x5bd   : > { %v1509_v28 = vmul.f32 %v1492_v16, %v1481_v22  ;;  %v1510_v30 = vmul.f32 %v1497_v21, %v1482_v23  ;;  %v1511_v33 = vmul.f32 %v1502_v32, %v1483_v26  ;;  %v1512_v36 = vmul.f32 %v1507_v35, %v1484_v27 }
 0x5bf   : > { %v1513_v34 = vadd.f32 %v1510_v30, %v1509_v28 }
 0x5c1   : > { %v1514_v37 = vadd.f32 %v1513_v34, %v1511_v33 }
 0x5c3   : > { %v1515_v38 = vadd.f32 %v1514_v37, %v1512_v36 }
 0x5c5   : > { %v1516_v39 = vrot.slane %v1515_v38, 4 }
 0x5c7   : > { %v1517_v40 = vadd.f32 %v1516_v39, %v1515_v38 }
 0x5c9   : > { %v1518_v41 = vrot.slane %v1517_v40, 2 }
 0x5cb   : > { %v1519_v42 = vadd.f32 %v1518_v41, %v1517_v40 }
 0x5cd   : > { %v1520_v43 = vrot.slane %v1519_v42, 1 }
 0x5cf   : > { %v1521_v44 = vadd.f32 %v1520_v43, %v1519_v42 }
 0x5d1   : > { %v1528_v45 = vadd.f32 %v1526_v58, %v1521_v44 }
 0x5d3   : > { %1529 = vst [vmem:[%s174_s23] sm:$0x1] %v1528_v45 }
 0x5d4   : > { %2059 = shalt.err (!%p2056_p11)
}
 0x5d5   : > { %s2060_s27 = scalar_lea.hbm %s2384_s26, 16  ;;  %s2064_s3 = scalar_lea.hbm %s2430_s2, 32 }
 0x5d6   : > { %p2061_p13 = scmp.ne.s32.totalorder %s2384_s26, %s2060_s27  ;;  %p2065_p12 = scmp.lt.u32.totalorder %s2384_s26, %s2430_s2 }
 0x5d7   : > { %p2066_p7 = scmp.lt.u32.totalorder %s2064_s3, %s2060_s27  ;;  %p2068_p8 = scmp.lt.u32.totalorder %s2060_s27, %s2384_s26 }
 0x5d8   : > { %p2062_p2 = pnand %p2061_p13, %p2448_p9 }
 0x5d9   : > { %p2067_p3 = por %p2066_p7, %p2065_p12 }
 0x5da   : > { %p2063_p6 = pneg %p2062_p2 }
 0x5db   : > { %p2069_p10 = por %p2068_p8, %p2067_p3 }
 0x5dd   : > { %p2070_p1 = pnand %p2069_p10, %p2063_p6 }
 0x5df   : > { %2073 = shalt.err (!%p2070_p1)
}
 0x5e0   : > { %1925 = dma.vmem_to_hbm [thread:$0]  (%p2448_p9), %s2386_s8, 16, %s2384_s26, %s1531_s19  }
 0x5e1 PF: > { %s1555_s6 = sand.u32 1, %s2104_s9   ;;  %p2449_p4 = scmp.ne.s32.totalorder %s2438_s22, 0 }
 0x5e2   : > { %p2450_p0 = scmp.ge.s32.totalorder %s2116_s12, 2  ;;  %s1556_s7 = scalar_lea.sflag [#allocation4], %s1555_s6 }
 0x5e4   : > { %p1936_p5 = pnand %p2450_p0, %p2449_p4 }
 0x5e6   : > { %2099 = dma.done.wait (!%p1936_p5), %s1556_s7, 16  }
 0x5e7   : > { %2101 = vsyncadd (!%p1936_p5), %s1556_s7, 4294967280  ;;  %p16_p11 = scmp.ge.s32.totalorder %s2165_s15, 4   ;;  %s2451_s9 = smov %s2108_s10 }
 0x5e8   : > { %s2452_s10 = smov %s2112_s11  ;;  %s2453_s11 = smov %s2177_s18 }
 0x5e9   : > { %s2454_s12 = smov %s2165_s15  ;;  %18 = sbr.rel (!%p16_p11) target bundleno = 6 (0x6), region = 77 }
 0x5f0   :  { %1560 = vsyncpa [#allocation3], 1 }
 0x5f1   :  { %1562 = vsyncpa [#allocation3 + $0x1], 1 }
 0x5f2   :  { %1563 = vsyncpa [#allocation6], 1 }
 0x5f3   :  { %1564 = vsyncpa [#allocation4], 1 }
 0x5f4   :  { %1566 = vsyncpa [#allocation4 + $0x1], 1 }

</bundles_post_ra>
